<compile_context>
chip_gen: v7x
topology: tpu7x:2x2x1
jax: 0.10.0
libtpu: 0.0.40
codegen_flags: <defaults>
</compile_context>

<pallas_src>
import jax
import jax.numpy as jnp
from jax import lax
from jax.experimental import pallas as pl
from jax.experimental.pallas import tpu as pltpu

# -------------------- configuration (small, synthetic) --------------------
VOCAB = 50        # vocab_size
EMBED = 16        # embed_size
HIDDEN = 32       # hidden_size
LAYERS = 1        # layer
BIDIR = True      # bidirection
DROP_RATE = 0.0   # drop_rate (eval semantics -> identity)
FC_CLA = 4        # fc_cla
B = 2             # batch
T = 8             # sequence length

H = HIDDEN
D = 2 * HIDDEN    # bidirectional feature width
G = 4 * HIDDEN    # gates per direction (natural layout)
GP = 128          # lane-aligned gate-group width (>= 2*H, multiple of 128)
GW = 4 * GP       # packed gate width (i | f | g | o), both directions


# ------------------------------ Pallas kernel ------------------------------
def _textrnn_attention_kernel(tok_ref,      # SMEM (B, T) int32 token ids
                              egf_ref,      # VMEM (VOCAB, GW)  emb @ W_ih_fwd + b_fwd
                              egb_ref,      # VMEM (VOCAB, GW)  emb @ W_ih_bwd + b_bwd
                              whh_ref,      # VMEM (GP, GW)     packed recurrent weights
                              ww_ref,       # VMEM (GP, GP)     attention linear (padded)
                              bw_ref,       # VMEM (1, GP)
                              w1_ref,       # VMEM (GP, H)      fc1 (rows padded)
                              b1_ref,       # VMEM (1, H)
                              w2_ref,       # VMEM (H, C)       fc
                              b2_ref,       # VMEM (1, C)
                              out_ref,      # VMEM (B, C)
                              gx_sc,        # VMEM scratch (T*B, GW) gathered gate inputs
                              hh_sc):       # VMEM scratch (T*B, GP) epilogue staging
    # ---- embedding gather + input projection (pre-folded into the tables) ----
    # row s*B+b holds: fwd gate lanes for time s  (token[b, s])
    #                + bwd gate lanes for time T-1-s (token[b, T-1-s])
    # These 16 single-row gathers are independent of the recurrent state, so
    # the scheduler overlaps them with the recurrence.
    for s in range(T):
        for b in range(B):
            tf_tok = tok_ref[b, s]
            tb_tok = tok_ref[b, T - 1 - s]
            r = s * B + b
            gx_sc[r:r + 1, :] = (egf_ref[pl.ds(tf_tok, 1), :]
                                 + egb_ref[pl.ds(tb_tok, 1), :])

    whh = whh_ref[...]                                            # (GP, GW)

    # ---- merged fwd/bwd LSTM recurrence, statically unrolled over T ----
    # h / c carry both directions: fwd in lanes [0,H), bwd in [H,2H), pad 0.
    h = jnp.zeros((B, GP), jnp.float32)
    c = jnp.zeros((B, GP), jnp.float32)
    hs = []                                   # tanh(lstm_out) per step, in vregs
    for s in range(T):
        g = gx_sc[s * B:(s + 1) * B, :] + jnp.dot(
            h, whh, preferred_element_type=jnp.float32)           # (B, GW)
        s_if = jax.nn.sigmoid(g[:, 0:2 * GP])     # one EUP pass for i and f
        gi = s_if[:, 0:GP]
        gf = s_if[:, GP:2 * GP]
        gg = jnp.tanh(g[:, 2 * GP:3 * GP])
        go = jax.nn.sigmoid(g[:, 3 * GP:4 * GP])
        c = gf * c + gi * gg
        h = go * jnp.tanh(c)
        # fwd half is time s, bwd half is time T-1-s; pad lanes stay exactly 0.
        hs.append(jnp.tanh(h))

    # ---- attention + fc tail (all off the recurrent chain) ----
    lane = lax.broadcasted_iota(jnp.int32, (B, GP), 1)
    is_fwd = lane < H
    hh_t = []                                  # time-aligned [h_f(t) | h_b(t) | 0]
    for t in range(T):
        v = jnp.where(is_fwd, hs[t], hs[T - 1 - t])               # lane select only
        hh_t.append(v)
        hh_sc[t * B:(t + 1) * B, :] = v        # one (B, GP) block write per time

    alpha = (jnp.dot(hh_sc[...], ww_ref[...],
                     preferred_element_type=jnp.float32)
             + bw_ref[...])                                       # (T*B, GP)

    # softmax over time + weighted sum, unrolled (pure VPU, no reductions)
    a_t = [alpha[t * B:(t + 1) * B, :] for t in range(T)]
    m = a_t[0]
    for t in range(1, T):
        m = jnp.maximum(m, a_t[t])
    e_t = [jnp.exp(a - m) for a in a_t]
    den = e_t[0]
    for t in range(1, T):
        den = den + e_t[t]
    att = hh_t[0] * e_t[0]
    for t in range(1, T):
        att = att + hh_t[t] * e_t[t]
    # exact reciprocal keeps the 1e-4 check vs the f32 reference
    att = att * pl.reciprocal(den)                                # (B, GP)
    att = jnp.tanh(att)

    z = jnp.dot(att, w1_ref[...], preferred_element_type=jnp.float32) + b1_ref[...]
    out = jnp.dot(z, w2_ref[...], preferred_element_type=jnp.float32) + b2_ref[...]
    out_ref[...] = out                          # single (B, C) store


# ------------------------------ wrapper / glue ------------------------------
_SMEM = pl.BlockSpec(memory_space=pltpu.MemorySpace.SMEM)
_VMEM = pl.BlockSpec(memory_space=pltpu.MemorySpace.VMEM)


def textrnn_attention_forward(x_tokens, pp):
    args = (x_tokens, pp['egf'], pp['egb'], pp['whh'], pp['ww'], pp['bw'],
            pp['w1'], pp['b1'], pp['w2'], pp['b2'])
    return pl.pallas_call(
        _textrnn_attention_kernel,
        out_shape=jax.ShapeDtypeStruct((B, FC_CLA), jnp.float32),
        in_specs=[_SMEM] + [_VMEM] * (len(args) - 1),
        out_specs=_VMEM,
        scratch_shapes=[pltpu.VMEM((T * B, GW), jnp.float32),
                        pltpu.VMEM((T * B, GP), jnp.float32)],
    )(*args)


# --------------------------- parameter initialization ---------------------------
def init_params(key):
    ks = iter(jax.random.split(key, 64))

    def u(shape, bound):
        return jax.random.uniform(next(ks), shape, jnp.float32, -bound, bound)

    p = {}
    emb = jax.random.normal(next(ks), (VOCAB, EMBED), jnp.float32)
    emb = emb.at[0].set(0.0)                         # padding_idx=0
    p['emb'] = emb

    k_lstm = 1.0 / (HIDDEN ** 0.5)
    p['lstm'] = []
    for l in range(LAYERS):
        in_size = EMBED if l == 0 else D
        p['lstm'].append({
            'wih_f': u((in_size, G), k_lstm),
            'whh_f': u((HIDDEN, G), k_lstm),
            'b_f':   u((1, G), k_lstm),              # (b_ih + b_hh) combined
            'wih_b': u((in_size, G), k_lstm),
            'whh_b': u((HIDDEN, G), k_lstm),
            'b_b':   u((1, G), k_lstm),
        })

    k_w = 1.0 / (D ** 0.5)
    k_fc = 1.0 / (HIDDEN ** 0.5)
    p['ww'] = u((D, D), k_w)                         # self.w   (stored transposed)
    p['bw'] = u((1, D), k_w)
    p['w1'] = u((D, HIDDEN), k_w)                    # self.fc1 (transposed)
    p['b1'] = u((1, HIDDEN), k_w)
    p['w2'] = u((HIDDEN, FC_CLA), k_fc)              # self.fc  (transposed)
    p['b2'] = u((1, FC_CLA), k_fc)
    return p


def pack_params(p):
    """One-time, exact layout packing of the natural-layout parameters:
      * gate columns placed into 128-lane-aligned groups [fwd H | bwd H | pad],
      * the embedding folded into per-direction (emb @ W_ih + b) gate tables,
      * attention / fc1 weights zero-padded to the 128-lane feature width."""
    assert LAYERS == 1 and BIDIR  # TODO(synk): other variants not fused here.
    lp = p['lstm'][0]

    def place_gates(w, off):
        # (K, 4H) natural gate order i,f,g,o -> (K, GW) with gate k at
        # lanes [k*GP + off, k*GP + off + H)
        out = jnp.zeros((w.shape[0], GW), jnp.float32)
        for k in range(4):
            out = out.at[:, k * GP + off:k * GP + off + H].set(
                w[:, k * H:(k + 1) * H])
        return out

    wih_f = place_gates(lp['wih_f'], 0)              # (E, GW)
    wih_b = place_gates(lp['wih_b'], H)
    b_f = place_gates(lp['b_f'], 0)                  # (1, GW)
    b_b = place_gates(lp['b_b'], H)

    whh = jnp.zeros((GP, GW), jnp.float32)
    whh = whh.at[0:H, :].set(place_gates(lp['whh_f'], 0))
    whh = whh.at[H:2 * H, :].set(place_gates(lp['whh_b'], H))

    # Fold the embedding into per-token gate tables (exact: the embedding only
    # feeds the LSTM input projection).  Row 0 (padding_idx) = bias only.
    egf = p['emb'] @ wih_f + b_f                     # (VOCAB, GW)
    egb = p['emb'] @ wih_b + b_b

    ww = jnp.zeros((GP, GP), jnp.float32).at[0:D, 0:D].set(p['ww'])
    bw = jnp.zeros((1, GP), jnp.float32).at[:, 0:D].set(p['bw'])
    w1 = jnp.zeros((GP, HIDDEN), jnp.float32).at[0:D, :].set(p['w1'])

    return dict(egf=egf, egb=egb, whh=whh, ww=ww, bw=bw,
                w1=w1, b1=p['b1'], w2=p['w2'], b2=p['b2'])


# ------------------------------ pure-JAX reference ------------------------------
def ref_forward(x_tokens, p):
    emb = jnp.take(p['emb'], x_tokens, axis=0).astype(jnp.float32)   # (B, T, E)

    def run_dir(x_bt, wih, whh, b, reverse):
        def cell(carry, x_t):
            h, c = carry
            gates = x_t @ wih + h @ whh + b[0]
            i = jax.nn.sigmoid(gates[:, :HIDDEN])
            f = jax.nn.sigmoid(gates[:, HIDDEN:2 * HIDDEN])
            g = jnp.tanh(gates[:, 2 * HIDDEN:3 * HIDDEN])
            o = jax.nn.sigmoid(gates[:, 3 * HIDDEN:])
            c = f * c + i * g
            h = o * jnp.tanh(c)
            return (h, c), h

        h0 = jnp.zeros((x_bt.shape[0], HIDDEN), jnp.float32)
        c0 = jnp.zeros((x_bt.shape[0], HIDDEN), jnp.float32)
        xs = jnp.transpose(x_bt, (1, 0, 2))
        if reverse:
            xs = xs[::-1]
        _, hs = lax.scan(cell, (h0, c0), xs)
        if reverse:
            hs = hs[::-1]
        return jnp.transpose(hs, (1, 0, 2))

    x_in = emb
    for l in range(LAYERS):
        lp = p['lstm'][l]
        hf = run_dir(x_in, lp['wih_f'], lp['whh_f'], lp['b_f'], False)
        hb = run_dir(x_in, lp['wih_b'], lp['whh_b'], lp['b_b'], True)
        x_in = jnp.concatenate([hf, hb], axis=-1)

    h = jnp.tanh(x_in)
    alpha = h @ p['ww'] + p['bw'][0]
    alpha = jax.nn.softmax(alpha, axis=1)
    out = jnp.sum(h * alpha, axis=1)
    out = jnp.tanh(out)
    out = out @ p['w1'] + p['b1'][0]
    out = out @ p['w2'] + p['b2'][0]
    return out


# ------------------------------------ main ------------------------------------
if __name__ == "__main__":
    key = jax.random.PRNGKey(0)
    k_tok, k_par = jax.random.split(key)
    x_tokens = jax.random.randint(k_tok, (B, T), 0, VOCAB, dtype=jnp.int32)
    params = init_params(k_par)
    packed = pack_params(params)

    fwd = jax.jit(textrnn_attention_forward)
    logits = fwd(x_tokens, packed)
    jax.block_until_ready(logits)

    ref = ref_forward(x_tokens, params)
    assert logits.shape == (B, FC_CLA)
    assert jnp.allclose(logits, ref, rtol=1e-4, atol=1e-4), (logits, ref)

    print("KERNEL_OK")
</pallas_src>

<mosaic_0001>
module attributes {stable_mosaic.version = 11 : i64} {
  func.func @_textrnn_attention_kernel(%arg0: memref<2x8xi32, #tpu.memory_space<smem>>, %arg1: memref<50x512xf32, #tpu.memory_space<vmem>>, %arg2: memref<50x512xf32, #tpu.memory_space<vmem>>, %arg3: memref<128x512xf32, #tpu.memory_space<vmem>>, %arg4: memref<128x128xf32, #tpu.memory_space<vmem>>, %arg5: memref<1x128xf32, #tpu.memory_space<vmem>>, %arg6: memref<128x32xf32, #tpu.memory_space<vmem>>, %arg7: memref<1x32xf32, #tpu.memory_space<vmem>>, %arg8: memref<32x4xf32, #tpu.memory_space<vmem>>, %arg9: memref<1x4xf32, #tpu.memory_space<vmem>>, %arg10: memref<2x4xf32, #tpu.memory_space<vmem>>, %arg11: memref<16x512xf32, #tpu.memory_space<vmem>>, %arg12: memref<16x128xf32, #tpu.memory_space<vmem>>) attributes {dimension_semantics = [], scalar_prefetch = 0 : i64, scratch_operands = 2 : i64, tpu.core_type = #tpu.core_type<tc>} {
    %c0 = arith.constant 0 : index
    %c0_0 = arith.constant 0 : index
    %0 = memref.load %arg0[%c0, %c0_0] : memref<2x8xi32, #tpu.memory_space<smem>>
    %c0_1 = arith.constant 0 : index
    %c7 = arith.constant 7 : index
    %1 = memref.load %arg0[%c0_1, %c7] : memref<2x8xi32, #tpu.memory_space<smem>>
    %2 = arith.index_cast %0 : i32 to index
    %c0_2 = arith.constant 0 : index
    %3 = vector.load %arg1[%2, %c0_2] : memref<50x512xf32, #tpu.memory_space<vmem>>, vector<1x512xf32>
    %4 = arith.index_cast %1 : i32 to index
    %c0_3 = arith.constant 0 : index
    %5 = vector.load %arg2[%4, %c0_3] : memref<50x512xf32, #tpu.memory_space<vmem>>, vector<1x512xf32>
    %6 = arith.addf %3, %5 : vector<1x512xf32>
    %c0_4 = arith.constant 0 : index
    %c0_5 = arith.constant 0 : index
    %7 = vector.load %arg11[%c0_4, %c0_5] : memref<16x512xf32, #tpu.memory_space<vmem>>, vector<1x512xf32>
    tpu.vector_store %arg11[%c0_4, %c0_5], %6 {strides = array<i32>} : memref<16x512xf32, #tpu.memory_space<vmem>>, vector<1x512xf32>,
    %c1 = arith.constant 1 : index
    %c0_6 = arith.constant 0 : index
    %8 = memref.load %arg0[%c1, %c0_6] : memref<2x8xi32, #tpu.memory_space<smem>>
    %c1_7 = arith.constant 1 : index
    %c7_8 = arith.constant 7 : index
    %9 = memref.load %arg0[%c1_7, %c7_8] : memref<2x8xi32, #tpu.memory_space<smem>>
    %10 = arith.index_cast %8 : i32 to index
    %c0_9 = arith.constant 0 : index
    %11 = vector.load %arg1[%10, %c0_9] : memref<50x512xf32, #tpu.memory_space<vmem>>, vector<1x512xf32>
    %12 = arith.index_cast %9 : i32 to index
    %c0_10 = arith.constant 0 : index
    %13 = vector.load %arg2[%12, %c0_10] : memref<50x512xf32, #tpu.memory_space<vmem>>, vector<1x512xf32>
    %14 = arith.addf %11, %13 : vector<1x512xf32>
    %c1_11 = arith.constant 1 : index
    %c0_12 = arith.constant 0 : index
    %15 = vector.load %arg11[%c1_11, %c0_12] : memref<16x512xf32, #tpu.memory_space<vmem>>, vector<1x512xf32>
    tpu.vector_store %arg11[%c1_11, %c0_12], %14 {strides = array<i32>} : memref<16x512xf32, #tpu.memory_space<vmem>>, vector<1x512xf32>,
    %c0_13 = arith.constant 0 : index
    %c1_14 = arith.constant 1 : index
    %16 = memref.load %arg0[%c0_13, %c1_14] : memref<2x8xi32, #tpu.memory_space<smem>>
    %c0_15 = arith.constant 0 : index
    %c6 = arith.constant 6 : index
    %17 = memref.load %arg0[%c0_15, %c6] : memref<2x8xi32, #tpu.memory_space<smem>>
    %18 = arith.index_cast %16 : i32 to index
    %c0_16 = arith.constant 0 : index
    %19 = vector.load %arg1[%18, %c0_16] : memref<50x512xf32, #tpu.memory_space<vmem>>, vector<1x512xf32>
    %20 = arith.index_cast %17 : i32 to index
    %c0_17 = arith.constant 0 : index
    %21 = vector.load %arg2[%20, %c0_17] : memref<50x512xf32, #tpu.memory_space<vmem>>, vector<1x512xf32>
    %22 = arith.addf %19, %21 : vector<1x512xf32>
    %c2 = arith.constant 2 : index
    %c0_18 = arith.constant 0 : index
    %23 = vector.load %arg11[%c2, %c0_18] : memref<16x512xf32, #tpu.memory_space<vmem>>, vector<1x512xf32>
    tpu.vector_store %arg11[%c2, %c0_18], %22 {strides = array<i32>} : memref<16x512xf32, #tpu.memory_space<vmem>>, vector<1x512xf32>,
    %c1_19 = arith.constant 1 : index
    %c1_20 = arith.constant 1 : index
    %24 = memref.load %arg0[%c1_19, %c1_20] : memref<2x8xi32, #tpu.memory_space<smem>>
    %c1_21 = arith.constant 1 : index
    %c6_22 = arith.constant 6 : index
    %25 = memref.load %arg0[%c1_21, %c6_22] : memref<2x8xi32, #tpu.memory_space<smem>>
    %26 = arith.index_cast %24 : i32 to index
    %c0_23 = arith.constant 0 : index
    %27 = vector.load %arg1[%26, %c0_23] : memref<50x512xf32, #tpu.memory_space<vmem>>, vector<1x512xf32>
    %28 = arith.index_cast %25 : i32 to index
    %c0_24 = arith.constant 0 : index
    %29 = vector.load %arg2[%28, %c0_24] : memref<50x512xf32, #tpu.memory_space<vmem>>, vector<1x512xf32>
    %30 = arith.addf %27, %29 : vector<1x512xf32>
    %c3 = arith.constant 3 : index
    %c0_25 = arith.constant 0 : index
    %31 = vector.load %arg11[%c3, %c0_25] : memref<16x512xf32, #tpu.memory_space<vmem>>, vector<1x512xf32>
    tpu.vector_store %arg11[%c3, %c0_25], %30 {strides = array<i32>} : memref<16x512xf32, #tpu.memory_space<vmem>>, vector<1x512xf32>,
    %c0_26 = arith.constant 0 : index
    %c2_27 = arith.constant 2 : index
    %32 = memref.load %arg0[%c0_26, %c2_27] : memref<2x8xi32, #tpu.memory_space<smem>>
    %c0_28 = arith.constant 0 : index
    %c5 = arith.constant 5 : index
    %33 = memref.load %arg0[%c0_28, %c5] : memref<2x8xi32, #tpu.memory_space<smem>>
    %34 = arith.index_cast %32 : i32 to index
    %c0_29 = arith.constant 0 : index
    %35 = vector.load %arg1[%34, %c0_29] : memref<50x512xf32, #tpu.memory_space<vmem>>, vector<1x512xf32>
    %36 = arith.index_cast %33 : i32 to index
    %c0_30 = arith.constant 0 : index
    %37 = vector.load %arg2[%36, %c0_30] : memref<50x512xf32, #tpu.memory_space<vmem>>, vector<1x512xf32>
    %38 = arith.addf %35, %37 : vector<1x512xf32>
    %c4 = arith.constant 4 : index
    %c0_31 = arith.constant 0 : index
    %39 = vector.load %arg11[%c4, %c0_31] : memref<16x512xf32, #tpu.memory_space<vmem>>, vector<1x512xf32>
    tpu.vector_store %arg11[%c4, %c0_31], %38 {strides = array<i32>} : memref<16x512xf32, #tpu.memory_space<vmem>>, vector<1x512xf32>,
    %c1_32 = arith.constant 1 : index
    %c2_33 = arith.constant 2 : index
    %40 = memref.load %arg0[%c1_32, %c2_33] : memref<2x8xi32, #tpu.memory_space<smem>>
    %c1_34 = arith.constant 1 : index
    %c5_35 = arith.constant 5 : index
    %41 = memref.load %arg0[%c1_34, %c5_35] : memref<2x8xi32, #tpu.memory_space<smem>>
    %42 = arith.index_cast %40 : i32 to index
    %c0_36 = arith.constant 0 : index
    %43 = vector.load %arg1[%42, %c0_36] : memref<50x512xf32, #tpu.memory_space<vmem>>, vector<1x512xf32>
    %44 = arith.index_cast %41 : i32 to index
    %c0_37 = arith.constant 0 : index
    %45 = vector.load %arg2[%44, %c0_37] : memref<50x512xf32, #tpu.memory_space<vmem>>, vector<1x512xf32>
    %46 = arith.addf %43, %45 : vector<1x512xf32>
    %c5_38 = arith.constant 5 : index
    %c0_39 = arith.constant 0 : index
    %47 = vector.load %arg11[%c5_38, %c0_39] : memref<16x512xf32, #tpu.memory_space<vmem>>, vector<1x512xf32>
    tpu.vector_store %arg11[%c5_38, %c0_39], %46 {strides = array<i32>} : memref<16x512xf32, #tpu.memory_space<vmem>>, vector<1x512xf32>,
    %c0_40 = arith.constant 0 : index
    %c3_41 = arith.constant 3 : index
    %48 = memref.load %arg0[%c0_40, %c3_41] : memref<2x8xi32, #tpu.memory_space<smem>>
    %c0_42 = arith.constant 0 : index
    %c4_43 = arith.constant 4 : index
    %49 = memref.load %arg0[%c0_42, %c4_43] : memref<2x8xi32, #tpu.memory_space<smem>>
    %50 = arith.index_cast %48 : i32 to index
    %c0_44 = arith.constant 0 : index
    %51 = vector.load %arg1[%50, %c0_44] : memref<50x512xf32, #tpu.memory_space<vmem>>, vector<1x512xf32>
    %52 = arith.index_cast %49 : i32 to index
    %c0_45 = arith.constant 0 : index
    %53 = vector.load %arg2[%52, %c0_45] : memref<50x512xf32, #tpu.memory_space<vmem>>, vector<1x512xf32>
    %54 = arith.addf %51, %53 : vector<1x512xf32>
    %c6_46 = arith.constant 6 : index
    %c0_47 = arith.constant 0 : index
    %55 = vector.load %arg11[%c6_46, %c0_47] : memref<16x512xf32, #tpu.memory_space<vmem>>, vector<1x512xf32>
    tpu.vector_store %arg11[%c6_46, %c0_47], %54 {strides = array<i32>} : memref<16x512xf32, #tpu.memory_space<vmem>>, vector<1x512xf32>,
    %c1_48 = arith.constant 1 : index
    %c3_49 = arith.constant 3 : index
    %56 = memref.load %arg0[%c1_48, %c3_49] : memref<2x8xi32, #tpu.memory_space<smem>>
    %c1_50 = arith.constant 1 : index
    %c4_51 = arith.constant 4 : index
    %57 = memref.load %arg0[%c1_50, %c4_51] : memref<2x8xi32, #tpu.memory_space<smem>>
    %58 = arith.index_cast %56 : i32 to index
    %c0_52 = arith.constant 0 : index
    %59 = vector.load %arg1[%58, %c0_52] : memref<50x512xf32, #tpu.memory_space<vmem>>, vector<1x512xf32>
    %60 = arith.index_cast %57 : i32 to index
    %c0_53 = arith.constant 0 : index
    %61 = vector.load %arg2[%60, %c0_53] : memref<50x512xf32, #tpu.memory_space<vmem>>, vector<1x512xf32>
    %62 = arith.addf %59, %61 : vector<1x512xf32>
    %c7_54 = arith.constant 7 : index
    %c0_55 = arith.constant 0 : index
    %63 = vector.load %arg11[%c7_54, %c0_55] : memref<16x512xf32, #tpu.memory_space<vmem>>, vector<1x512xf32>
    tpu.vector_store %arg11[%c7_54, %c0_55], %62 {strides = array<i32>} : memref<16x512xf32, #tpu.memory_space<vmem>>, vector<1x512xf32>,
    %c0_56 = arith.constant 0 : index
    %c4_57 = arith.constant 4 : index
    %64 = memref.load %arg0[%c0_56, %c4_57] : memref<2x8xi32, #tpu.memory_space<smem>>
    %c0_58 = arith.constant 0 : index
    %c3_59 = arith.constant 3 : index
    %65 = memref.load %arg0[%c0_58, %c3_59] : memref<2x8xi32, #tpu.memory_space<smem>>
    %66 = arith.index_cast %64 : i32 to index
    %c0_60 = arith.constant 0 : index
    %67 = vector.load %arg1[%66, %c0_60] : memref<50x512xf32, #tpu.memory_space<vmem>>, vector<1x512xf32>
    %68 = arith.index_cast %65 : i32 to index
    %c0_61 = arith.constant 0 : index
    %69 = vector.load %arg2[%68, %c0_61] : memref<50x512xf32, #tpu.memory_space<vmem>>, vector<1x512xf32>
    %70 = arith.addf %67, %69 : vector<1x512xf32>
    %c8 = arith.constant 8 : index
    %c0_62 = arith.constant 0 : index
    %71 = vector.load %arg11[%c8, %c0_62] : memref<16x512xf32, #tpu.memory_space<vmem>>, vector<1x512xf32>
    tpu.vector_store %arg11[%c8, %c0_62], %70 {strides = array<i32>} : memref<16x512xf32, #tpu.memory_space<vmem>>, vector<1x512xf32>,
    %c1_63 = arith.constant 1 : index
    %c4_64 = arith.constant 4 : index
    %72 = memref.load %arg0[%c1_63, %c4_64] : memref<2x8xi32, #tpu.memory_space<smem>>
    %c1_65 = arith.constant 1 : index
    %c3_66 = arith.constant 3 : index
    %73 = memref.load %arg0[%c1_65, %c3_66] : memref<2x8xi32, #tpu.memory_space<smem>>
    %74 = arith.index_cast %72 : i32 to index
    %c0_67 = arith.constant 0 : index
    %75 = vector.load %arg1[%74, %c0_67] : memref<50x512xf32, #tpu.memory_space<vmem>>, vector<1x512xf32>
    %76 = arith.index_cast %73 : i32 to index
    %c0_68 = arith.constant 0 : index
    %77 = vector.load %arg2[%76, %c0_68] : memref<50x512xf32, #tpu.memory_space<vmem>>, vector<1x512xf32>
    %78 = arith.addf %75, %77 : vector<1x512xf32>
    %c9 = arith.constant 9 : index
    %c0_69 = arith.constant 0 : index
    %79 = vector.load %arg11[%c9, %c0_69] : memref<16x512xf32, #tpu.memory_space<vmem>>, vector<1x512xf32>
    tpu.vector_store %arg11[%c9, %c0_69], %78 {strides = array<i32>} : memref<16x512xf32, #tpu.memory_space<vmem>>, vector<1x512xf32>,
    %c0_70 = arith.constant 0 : index
    %c5_71 = arith.constant 5 : index
    %80 = memref.load %arg0[%c0_70, %c5_71] : memref<2x8xi32, #tpu.memory_space<smem>>
    %c0_72 = arith.constant 0 : index
    %c2_73 = arith.constant 2 : index
    %81 = memref.load %arg0[%c0_72, %c2_73] : memref<2x8xi32, #tpu.memory_space<smem>>
    %82 = arith.index_cast %80 : i32 to index
    %c0_74 = arith.constant 0 : index
    %83 = vector.load %arg1[%82, %c0_74] : memref<50x512xf32, #tpu.memory_space<vmem>>, vector<1x512xf32>
    %84 = arith.index_cast %81 : i32 to index
    %c0_75 = arith.constant 0 : index
    %85 = vector.load %arg2[%84, %c0_75] : memref<50x512xf32, #tpu.memory_space<vmem>>, vector<1x512xf32>
    %86 = arith.addf %83, %85 : vector<1x512xf32>
    %c10 = arith.constant 10 : index
    %c0_76 = arith.constant 0 : index
    %87 = vector.load %arg11[%c10, %c0_76] : memref<16x512xf32, #tpu.memory_space<vmem>>, vector<1x512xf32>
    tpu.vector_store %arg11[%c10, %c0_76], %86 {strides = array<i32>} : memref<16x512xf32, #tpu.memory_space<vmem>>, vector<1x512xf32>,
    %c1_77 = arith.constant 1 : index
    %c5_78 = arith.constant 5 : index
    %88 = memref.load %arg0[%c1_77, %c5_78] : memref<2x8xi32, #tpu.memory_space<smem>>
    %c1_79 = arith.constant 1 : index
    %c2_80 = arith.constant 2 : index
    %89 = memref.load %arg0[%c1_79, %c2_80] : memref<2x8xi32, #tpu.memory_space<smem>>
    %90 = arith.index_cast %88 : i32 to index
    %c0_81 = arith.constant 0 : index
    %91 = vector.load %arg1[%90, %c0_81] : memref<50x512xf32, #tpu.memory_space<vmem>>, vector<1x512xf32>
    %92 = arith.index_cast %89 : i32 to index
    %c0_82 = arith.constant 0 : index
    %93 = vector.load %arg2[%92, %c0_82] : memref<50x512xf32, #tpu.memory_space<vmem>>, vector<1x512xf32>
    %94 = arith.addf %91, %93 : vector<1x512xf32>
    %c11 = arith.constant 11 : index
    %c0_83 = arith.constant 0 : index
    %95 = vector.load %arg11[%c11, %c0_83] : memref<16x512xf32, #tpu.memory_space<vmem>>, vector<1x512xf32>
    tpu.vector_store %arg11[%c11, %c0_83], %94 {strides = array<i32>} : memref<16x512xf32, #tpu.memory_space<vmem>>, vector<1x512xf32>,
    %c0_84 = arith.constant 0 : index
    %c6_85 = arith.constant 6 : index
    %96 = memref.load %arg0[%c0_84, %c6_85] : memref<2x8xi32, #tpu.memory_space<smem>>
    %c0_86 = arith.constant 0 : index
    %c1_87 = arith.constant 1 : index
    %97 = memref.load %arg0[%c0_86, %c1_87] : memref<2x8xi32, #tpu.memory_space<smem>>
    %98 = arith.index_cast %96 : i32 to index
    %c0_88 = arith.constant 0 : index
    %99 = vector.load %arg1[%98, %c0_88] : memref<50x512xf32, #tpu.memory_space<vmem>>, vector<1x512xf32>
    %100 = arith.index_cast %97 : i32 to index
    %c0_89 = arith.constant 0 : index
    %101 = vector.load %arg2[%100, %c0_89] : memref<50x512xf32, #tpu.memory_space<vmem>>, vector<1x512xf32>
    %102 = arith.addf %99, %101 : vector<1x512xf32>
    %c12 = arith.constant 12 : index
    %c0_90 = arith.constant 0 : index
    %103 = vector.load %arg11[%c12, %c0_90] : memref<16x512xf32, #tpu.memory_space<vmem>>, vector<1x512xf32>
    tpu.vector_store %arg11[%c12, %c0_90], %102 {strides = array<i32>} : memref<16x512xf32, #tpu.memory_space<vmem>>, vector<1x512xf32>,
    %c1_91 = arith.constant 1 : index
    %c6_92 = arith.constant 6 : index
    %104 = memref.load %arg0[%c1_91, %c6_92] : memref<2x8xi32, #tpu.memory_space<smem>>
    %c1_93 = arith.constant 1 : index
    %c1_94 = arith.constant 1 : index
    %105 = memref.load %arg0[%c1_93, %c1_94] : memref<2x8xi32, #tpu.memory_space<smem>>
    %106 = arith.index_cast %104 : i32 to index
    %c0_95 = arith.constant 0 : index
    %107 = vector.load %arg1[%106, %c0_95] : memref<50x512xf32, #tpu.memory_space<vmem>>, vector<1x512xf32>
    %108 = arith.index_cast %105 : i32 to index
    %c0_96 = arith.constant 0 : index
    %109 = vector.load %arg2[%108, %c0_96] : memref<50x512xf32, #tpu.memory_space<vmem>>, vector<1x512xf32>
    %110 = arith.addf %107, %109 : vector<1x512xf32>
    %c13 = arith.constant 13 : index
    %c0_97 = arith.constant 0 : index
    %111 = vector.load %arg11[%c13, %c0_97] : memref<16x512xf32, #tpu.memory_space<vmem>>, vector<1x512xf32>
    tpu.vector_store %arg11[%c13, %c0_97], %110 {strides = array<i32>} : memref<16x512xf32, #tpu.memory_space<vmem>>, vector<1x512xf32>,
    %c0_98 = arith.constant 0 : index
    %c7_99 = arith.constant 7 : index
    %112 = memref.load %arg0[%c0_98, %c7_99] : memref<2x8xi32, #tpu.memory_space<smem>>
    %c0_100 = arith.constant 0 : index
    %c0_101 = arith.constant 0 : index
    %113 = memref.load %arg0[%c0_100, %c0_101] : memref<2x8xi32, #tpu.memory_space<smem>>
    %114 = arith.index_cast %112 : i32 to index
    %c0_102 = arith.constant 0 : index
    %115 = vector.load %arg1[%114, %c0_102] : memref<50x512xf32, #tpu.memory_space<vmem>>, vector<1x512xf32>
    %116 = arith.index_cast %113 : i32 to index
    %c0_103 = arith.constant 0 : index
    %117 = vector.load %arg2[%116, %c0_103] : memref<50x512xf32, #tpu.memory_space<vmem>>, vector<1x512xf32>
    %118 = arith.addf %115, %117 : vector<1x512xf32>
    %c14 = arith.constant 14 : index
    %c0_104 = arith.constant 0 : index
    %119 = vector.load %arg11[%c14, %c0_104] : memref<16x512xf32, #tpu.memory_space<vmem>>, vector<1x512xf32>
    tpu.vector_store %arg11[%c14, %c0_104], %118 {strides = array<i32>} : memref<16x512xf32, #tpu.memory_space<vmem>>, vector<1x512xf32>,
    %c1_105 = arith.constant 1 : index
    %c7_106 = arith.constant 7 : index
    %120 = memref.load %arg0[%c1_105, %c7_106] : memref<2x8xi32, #tpu.memory_space<smem>>
    %c1_107 = arith.constant 1 : index
    %c0_108 = arith.constant 0 : index
    %121 = memref.load %arg0[%c1_107, %c0_108] : memref<2x8xi32, #tpu.memory_space<smem>>
    %122 = arith.index_cast %120 : i32 to index
    %c0_109 = arith.constant 0 : index
    %123 = vector.load %arg1[%122, %c0_109] : memref<50x512xf32, #tpu.memory_space<vmem>>, vector<1x512xf32>
    %124 = arith.index_cast %121 : i32 to index
    %c0_110 = arith.constant 0 : index
    %125 = vector.load %arg2[%124, %c0_110] : memref<50x512xf32, #tpu.memory_space<vmem>>, vector<1x512xf32>
    %126 = arith.addf %123, %125 : vector<1x512xf32>
    %c15 = arith.constant 15 : index
    %c0_111 = arith.constant 0 : index
    %127 = vector.load %arg11[%c15, %c0_111] : memref<16x512xf32, #tpu.memory_space<vmem>>, vector<1x512xf32>
    tpu.vector_store %arg11[%c15, %c0_111], %126 {strides = array<i32>} : memref<16x512xf32, #tpu.memory_space<vmem>>, vector<1x512xf32>,
    %c0_112 = arith.constant 0 : index
    %c0_113 = arith.constant 0 : index
    %128 = vector.load %arg3[%c0_112, %c0_113] : memref<128x512xf32, #tpu.memory_space<vmem>>, vector<128x512xf32>
    %cst = arith.constant 0.000000e+00 : f32
    %129 = vector.broadcast %cst : f32 to vector<2x128xf32>
    %cst_114 = arith.constant 0.000000e+00 : f32
    %130 = vector.broadcast %cst_114 : f32 to vector<2x128xf32>
    %c0_115 = arith.constant 0 : index
    %c0_116 = arith.constant 0 : index
    %131 = vector.load %arg11[%c0_115, %c0_116] : memref<16x512xf32, #tpu.memory_space<vmem>>, vector<2x512xf32>
    %cst_117 = arith.constant dense<0.000000e+00> : vector<2x512xf32>
    %132 = tpu.matmul %129, %128, %cst_117 {dimension_numbers = #tpu.dot_dimension_numbers<[1], [0], [0], [1], [0, 0, 1, 1], [], []>} : vector<2x128xf32>, vector<128x512xf32>, vector<2x512xf32> -> vector<2x512xf32>
    %133 = arith.addf %131, %132 : vector<2x512xf32>
    %134 = vector.extract_strided_slice %133 {offsets = [0, 0], sizes = [2, 256], strides = [1, 1]} : vector<2x512xf32> to vector<2x256xf32>
    %135 = arith.negf %134 : vector<2x256xf32>
    %136 = math.exp %135 : vector<2x256xf32>
    %cst_118 = arith.constant 1.000000e+00 : f32
    %137 = vector.broadcast %cst_118 : f32 to vector<2x256xf32>
    %138 = arith.addf %137, %136 : vector<2x256xf32>
    %139 = arith.divf %137, %138 : vector<2x256xf32>
    %140 = vector.extract_strided_slice %139 {offsets = [0, 0], sizes = [2, 128], strides = [1, 1]} : vector<2x256xf32> to vector<2x128xf32>
    %141 = vector.extract_strided_slice %139 {offsets = [0, 128], sizes = [2, 128], strides = [1, 1]} : vector<2x256xf32> to vector<2x128xf32>
    %142 = vector.extract_strided_slice %133 {offsets = [0, 256], sizes = [2, 128], strides = [1, 1]} : vector<2x512xf32> to vector<2x128xf32>
    %143 = math.tanh %142 : vector<2x128xf32>
    %144 = vector.extract_strided_slice %133 {offsets = [0, 384], sizes = [2, 128], strides = [1, 1]} : vector<2x512xf32> to vector<2x128xf32>
    %145 = arith.negf %144 : vector<2x128xf32>
    %146 = math.exp %145 : vector<2x128xf32>
    %cst_119 = arith.constant 1.000000e+00 : f32
    %147 = vector.broadcast %cst_119 : f32 to vector<2x128xf32>
    %148 = arith.addf %147, %146 : vector<2x128xf32>
    %149 = arith.divf %147, %148 : vector<2x128xf32>
    %150 = arith.mulf %141, %130 : vector<2x128xf32>
    %151 = arith.mulf %140, %143 : vector<2x128xf32>
    %152 = arith.addf %150, %151 : vector<2x128xf32>
    %153 = math.tanh %152 : vector<2x128xf32>
    %154 = arith.mulf %149, %153 : vector<2x128xf32>
    %155 = math.tanh %154 : vector<2x128xf32>
    %c2_120 = arith.constant 2 : index
    %c0_121 = arith.constant 0 : index
    %156 = vector.load %arg11[%c2_120, %c0_121] : memref<16x512xf32, #tpu.memory_space<vmem>>, vector<2x512xf32>
    %cst_122 = arith.constant dense<0.000000e+00> : vector<2x512xf32>
    %157 = tpu.matmul %154, %128, %cst_122 {dimension_numbers = #tpu.dot_dimension_numbers<[1], [0], [0], [1], [0, 0, 1, 1], [], []>} : vector<2x128xf32>, vector<128x512xf32>, vector<2x512xf32> -> vector<2x512xf32>
    %158 = arith.addf %156, %157 : vector<2x512xf32>
    %159 = vector.extract_strided_slice %158 {offsets = [0, 0], sizes = [2, 256], strides = [1, 1]} : vector<2x512xf32> to vector<2x256xf32>
    %160 = arith.negf %159 : vector<2x256xf32>
    %161 = math.exp %160 : vector<2x256xf32>
    %cst_123 = arith.constant 1.000000e+00 : f32
    %162 = vector.broadcast %cst_123 : f32 to vector<2x256xf32>
    %163 = arith.addf %162, %161 : vector<2x256xf32>
    %164 = arith.divf %162, %163 : vector<2x256xf32>
    %165 = vector.extract_strided_slice %164 {offsets = [0, 0], sizes = [2, 128], strides = [1, 1]} : vector<2x256xf32> to vector<2x128xf32>
    %166 = vector.extract_strided_slice %164 {offsets = [0, 128], sizes = [2, 128], strides = [1, 1]} : vector<2x256xf32> to vector<2x128xf32>
    %167 = vector.extract_strided_slice %158 {offsets = [0, 256], sizes = [2, 128], strides = [1, 1]} : vector<2x512xf32> to vector<2x128xf32>
    %168 = math.tanh %167 : vector<2x128xf32>
    %169 = vector.extract_strided_slice %158 {offsets = [0, 384], sizes = [2, 128], strides = [1, 1]} : vector<2x512xf32> to vector<2x128xf32>
    %170 = arith.negf %169 : vector<2x128xf32>
    %171 = math.exp %170 : vector<2x128xf32>
    %cst_124 = arith.constant 1.000000e+00 : f32
    %172 = vector.broadcast %cst_124 : f32 to vector<2x128xf32>
    %173 = arith.addf %172, %171 : vector<2x128xf32>
    %174 = arith.divf %172, %173 : vector<2x128xf32>
    %175 = arith.mulf %166, %152 : vector<2x128xf32>
    %176 = arith.mulf %165, %168 : vector<2x128xf32>
    %177 = arith.addf %175, %176 : vector<2x128xf32>
    %178 = math.tanh %177 : vector<2x128xf32>
    %179 = arith.mulf %174, %178 : vector<2x128xf32>
    %180 = math.tanh %179 : vector<2x128xf32>
    %c4_125 = arith.constant 4 : index
    %c0_126 = arith.constant 0 : index
    %181 = vector.load %arg11[%c4_125, %c0_126] : memref<16x512xf32, #tpu.memory_space<vmem>>, vector<2x512xf32>
    %cst_127 = arith.constant dense<0.000000e+00> : vector<2x512xf32>
    %182 = tpu.matmul %179, %128, %cst_127 {dimension_numbers = #tpu.dot_dimension_numbers<[1], [0], [0], [1], [0, 0, 1, 1], [], []>} : vector<2x128xf32>, vector<128x512xf32>, vector<2x512xf32> -> vector<2x512xf32>
    %183 = arith.addf %181, %182 : vector<2x512xf32>
    %184 = vector.extract_strided_slice %183 {offsets = [0, 0], sizes = [2, 256], strides = [1, 1]} : vector<2x512xf32> to vector<2x256xf32>
    %185 = arith.negf %184 : vector<2x256xf32>
    %186 = math.exp %185 : vector<2x256xf32>
    %cst_128 = arith.constant 1.000000e+00 : f32
    %187 = vector.broadcast %cst_128 : f32 to vector<2x256xf32>
    %188 = arith.addf %187, %186 : vector<2x256xf32>
    %189 = arith.divf %187, %188 : vector<2x256xf32>
    %190 = vector.extract_strided_slice %189 {offsets = [0, 0], sizes = [2, 128], strides = [1, 1]} : vector<2x256xf32> to vector<2x128xf32>
    %191 = vector.extract_strided_slice %189 {offsets = [0, 128], sizes = [2, 128], strides = [1, 1]} : vector<2x256xf32> to vector<2x128xf32>
    %192 = vector.extract_strided_slice %183 {offsets = [0, 256], sizes = [2, 128], strides = [1, 1]} : vector<2x512xf32> to vector<2x128xf32>
    %193 = math.tanh %192 : vector<2x128xf32>
    %194 = vector.extract_strided_slice %183 {offsets = [0, 384], sizes = [2, 128], strides = [1, 1]} : vector<2x512xf32> to vector<2x128xf32>
    %195 = arith.negf %194 : vector<2x128xf32>
    %196 = math.exp %195 : vector<2x128xf32>
    %cst_129 = arith.constant 1.000000e+00 : f32
    %197 = vector.broadcast %cst_129 : f32 to vector<2x128xf32>
    %198 = arith.addf %197, %196 : vector<2x128xf32>
    %199 = arith.divf %197, %198 : vector<2x128xf32>
    %200 = arith.mulf %191, %177 : vector<2x128xf32>
    %201 = arith.mulf %190, %193 : vector<2x128xf32>
    %202 = arith.addf %200, %201 : vector<2x128xf32>
    %203 = math.tanh %202 : vector<2x128xf32>
    %204 = arith.mulf %199, %203 : vector<2x128xf32>
    %205 = math.tanh %204 : vector<2x128xf32>
    %c6_130 = arith.constant 6 : index
    %c0_131 = arith.constant 0 : index
    %206 = vector.load %arg11[%c6_130, %c0_131] : memref<16x512xf32, #tpu.memory_space<vmem>>, vector<2x512xf32>
    %cst_132 = arith.constant dense<0.000000e+00> : vector<2x512xf32>
    %207 = tpu.matmul %204, %128, %cst_132 {dimension_numbers = #tpu.dot_dimension_numbers<[1], [0], [0], [1], [0, 0, 1, 1], [], []>} : vector<2x128xf32>, vector<128x512xf32>, vector<2x512xf32> -> vector<2x512xf32>
    %208 = arith.addf %206, %207 : vector<2x512xf32>
    %209 = vector.extract_strided_slice %208 {offsets = [0, 0], sizes = [2, 256], strides = [1, 1]} : vector<2x512xf32> to vector<2x256xf32>
    %210 = arith.negf %209 : vector<2x256xf32>
    %211 = math.exp %210 : vector<2x256xf32>
    %cst_133 = arith.constant 1.000000e+00 : f32
    %212 = vector.broadcast %cst_133 : f32 to vector<2x256xf32>
    %213 = arith.addf %212, %211 : vector<2x256xf32>
    %214 = arith.divf %212, %213 : vector<2x256xf32>
    %215 = vector.extract_strided_slice %214 {offsets = [0, 0], sizes = [2, 128], strides = [1, 1]} : vector<2x256xf32> to vector<2x128xf32>
    %216 = vector.extract_strided_slice %214 {offsets = [0, 128], sizes = [2, 128], strides = [1, 1]} : vector<2x256xf32> to vector<2x128xf32>
    %217 = vector.extract_strided_slice %208 {offsets = [0, 256], sizes = [2, 128], strides = [1, 1]} : vector<2x512xf32> to vector<2x128xf32>
    %218 = math.tanh %217 : vector<2x128xf32>
    %219 = vector.extract_strided_slice %208 {offsets = [0, 384], sizes = [2, 128], strides = [1, 1]} : vector<2x512xf32> to vector<2x128xf32>
    %220 = arith.negf %219 : vector<2x128xf32>
    %221 = math.exp %220 : vector<2x128xf32>
    %cst_134 = arith.constant 1.000000e+00 : f32
    %222 = vector.broadcast %cst_134 : f32 to vector<2x128xf32>
    %223 = arith.addf %222, %221 : vector<2x128xf32>
    %224 = arith.divf %222, %223 : vector<2x128xf32>
    %225 = arith.mulf %216, %202 : vector<2x128xf32>
    %226 = arith.mulf %215, %218 : vector<2x128xf32>
    %227 = arith.addf %225, %226 : vector<2x128xf32>
    %228 = math.tanh %227 : vector<2x128xf32>
    %229 = arith.mulf %224, %228 : vector<2x128xf32>
    %230 = math.tanh %229 : vector<2x128xf32>
    %c8_135 = arith.constant 8 : index
    %c0_136 = arith.constant 0 : index
    %231 = vector.load %arg11[%c8_135, %c0_136] : memref<16x512xf32, #tpu.memory_space<vmem>>, vector<2x512xf32>
    %cst_137 = arith.constant dense<0.000000e+00> : vector<2x512xf32>
    %232 = tpu.matmul %229, %128, %cst_137 {dimension_numbers = #tpu.dot_dimension_numbers<[1], [0], [0], [1], [0, 0, 1, 1], [], []>} : vector<2x128xf32>, vector<128x512xf32>, vector<2x512xf32> -> vector<2x512xf32>
    %233 = arith.addf %231, %232 : vector<2x512xf32>
    %234 = vector.extract_strided_slice %233 {offsets = [0, 0], sizes = [2, 256], strides = [1, 1]} : vector<2x512xf32> to vector<2x256xf32>
    %235 = arith.negf %234 : vector<2x256xf32>
    %236 = math.exp %235 : vector<2x256xf32>
    %cst_138 = arith.constant 1.000000e+00 : f32
    %237 = vector.broadcast %cst_138 : f32 to vector<2x256xf32>
    %238 = arith.addf %237, %236 : vector<2x256xf32>
    %239 = arith.divf %237, %238 : vector<2x256xf32>
    %240 = vector.extract_strided_slice %239 {offsets = [0, 0], sizes = [2, 128], strides = [1, 1]} : vector<2x256xf32> to vector<2x128xf32>
    %241 = vector.extract_strided_slice %239 {offsets = [0, 128], sizes = [2, 128], strides = [1, 1]} : vector<2x256xf32> to vector<2x128xf32>
    %242 = vector.extract_strided_slice %233 {offsets = [0, 256], sizes = [2, 128], strides = [1, 1]} : vector<2x512xf32> to vector<2x128xf32>
    %243 = math.tanh %242 : vector<2x128xf32>
    %244 = vector.extract_strided_slice %233 {offsets = [0, 384], sizes = [2, 128], strides = [1, 1]} : vector<2x512xf32> to vector<2x128xf32>
    %245 = arith.negf %244 : vector<2x128xf32>
    %246 = math.exp %245 : vector<2x128xf32>
    %cst_139 = arith.constant 1.000000e+00 : f32
    %247 = vector.broadcast %cst_139 : f32 to vector<2x128xf32>
    %248 = arith.addf %247, %246 : vector<2x128xf32>
    %249 = arith.divf %247, %248 : vector<2x128xf32>
    %250 = arith.mulf %241, %227 : vector<2x128xf32>
    %251 = arith.mulf %240, %243 : vector<2x128xf32>
    %252 = arith.addf %250, %251 : vector<2x128xf32>
    %253 = math.tanh %252 : vector<2x128xf32>
    %254 = arith.mulf %249, %253 : vector<2x128xf32>
    %255 = math.tanh %254 : vector<2x128xf32>
    %c10_140 = arith.constant 10 : index
    %c0_141 = arith.constant 0 : index
    %256 = vector.load %arg11[%c10_140, %c0_141] : memref<16x512xf32, #tpu.memory_space<vmem>>, vector<2x512xf32>
    %cst_142 = arith.constant dense<0.000000e+00> : vector<2x512xf32>
    %257 = tpu.matmul %254, %128, %cst_142 {dimension_numbers = #tpu.dot_dimension_numbers<[1], [0], [0], [1], [0, 0, 1, 1], [], []>} : vector<2x128xf32>, vector<128x512xf32>, vector<2x512xf32> -> vector<2x512xf32>
    %258 = arith.addf %256, %257 : vector<2x512xf32>
    %259 = vector.extract_strided_slice %258 {offsets = [0, 0], sizes = [2, 256], strides = [1, 1]} : vector<2x512xf32> to vector<2x256xf32>
    %260 = arith.negf %259 : vector<2x256xf32>
    %261 = math.exp %260 : vector<2x256xf32>
    %cst_143 = arith.constant 1.000000e+00 : f32
    %262 = vector.broadcast %cst_143 : f32 to vector<2x256xf32>
    %263 = arith.addf %262, %261 : vector<2x256xf32>
    %264 = arith.divf %262, %263 : vector<2x256xf32>
    %265 = vector.extract_strided_slice %264 {offsets = [0, 0], sizes = [2, 128], strides = [1, 1]} : vector<2x256xf32> to vector<2x128xf32>
    %266 = vector.extract_strided_slice %264 {offsets = [0, 128], sizes = [2, 128], strides = [1, 1]} : vector<2x256xf32> to vector<2x128xf32>
    %267 = vector.extract_strided_slice %258 {offsets = [0, 256], sizes = [2, 128], strides = [1, 1]} : vector<2x512xf32> to vector<2x128xf32>
    %268 = math.tanh %267 : vector<2x128xf32>
    %269 = vector.extract_strided_slice %258 {offsets = [0, 384], sizes = [2, 128], strides = [1, 1]} : vector<2x512xf32> to vector<2x128xf32>
    %270 = arith.negf %269 : vector<2x128xf32>
    %271 = math.exp %270 : vector<2x128xf32>
    %cst_144 = arith.constant 1.000000e+00 : f32
    %272 = vector.broadcast %cst_144 : f32 to vector<2x128xf32>
    %273 = arith.addf %272, %271 : vector<2x128xf32>
    %274 = arith.divf %272, %273 : vector<2x128xf32>
    %275 = arith.mulf %266, %252 : vector<2x128xf32>
    %276 = arith.mulf %265, %268 : vector<2x128xf32>
    %277 = arith.addf %275, %276 : vector<2x128xf32>
    %278 = math.tanh %277 : vector<2x128xf32>
    %279 = arith.mulf %274, %278 : vector<2x128xf32>
    %280 = math.tanh %279 : vector<2x128xf32>
    %c12_145 = arith.constant 12 : index
    %c0_146 = arith.constant 0 : index
    %281 = vector.load %arg11[%c12_145, %c0_146] : memref<16x512xf32, #tpu.memory_space<vmem>>, vector<2x512xf32>
    %cst_147 = arith.constant dense<0.000000e+00> : vector<2x512xf32>
    %282 = tpu.matmul %279, %128, %cst_147 {dimension_numbers = #tpu.dot_dimension_numbers<[1], [0], [0], [1], [0, 0, 1, 1], [], []>} : vector<2x128xf32>, vector<128x512xf32>, vector<2x512xf32> -> vector<2x512xf32>
    %283 = arith.addf %281, %282 : vector<2x512xf32>
    %284 = vector.extract_strided_slice %283 {offsets = [0, 0], sizes = [2, 256], strides = [1, 1]} : vector<2x512xf32> to vector<2x256xf32>
    %285 = arith.negf %284 : vector<2x256xf32>
    %286 = math.exp %285 : vector<2x256xf32>
    %cst_148 = arith.constant 1.000000e+00 : f32
    %287 = vector.broadcast %cst_148 : f32 to vector<2x256xf32>
    %288 = arith.addf %287, %286 : vector<2x256xf32>
    %289 = arith.divf %287, %288 : vector<2x256xf32>
    %290 = vector.extract_strided_slice %289 {offsets = [0, 0], sizes = [2, 128], strides = [1, 1]} : vector<2x256xf32> to vector<2x128xf32>
    %291 = vector.extract_strided_slice %289 {offsets = [0, 128], sizes = [2, 128], strides = [1, 1]} : vector<2x256xf32> to vector<2x128xf32>
    %292 = vector.extract_strided_slice %283 {offsets = [0, 256], sizes = [2, 128], strides = [1, 1]} : vector<2x512xf32> to vector<2x128xf32>
    %293 = math.tanh %292 : vector<2x128xf32>
    %294 = vector.extract_strided_slice %283 {offsets = [0, 384], sizes = [2, 128], strides = [1, 1]} : vector<2x512xf32> to vector<2x128xf32>
    %295 = arith.negf %294 : vector<2x128xf32>
    %296 = math.exp %295 : vector<2x128xf32>
    %cst_149 = arith.constant 1.000000e+00 : f32
    %297 = vector.broadcast %cst_149 : f32 to vector<2x128xf32>
    %298 = arith.addf %297, %296 : vector<2x128xf32>
    %299 = arith.divf %297, %298 : vector<2x128xf32>
    %300 = arith.mulf %291, %277 : vector<2x128xf32>
    %301 = arith.mulf %290, %293 : vector<2x128xf32>
    %302 = arith.addf %300, %301 : vector<2x128xf32>
    %303 = math.tanh %302 : vector<2x128xf32>
    %304 = arith.mulf %299, %303 : vector<2x128xf32>
    %305 = math.tanh %304 : vector<2x128xf32>
    %c14_150 = arith.constant 14 : index
    %c0_151 = arith.constant 0 : index
    %306 = vector.load %arg11[%c14_150, %c0_151] : memref<16x512xf32, #tpu.memory_space<vmem>>, vector<2x512xf32>
    %cst_152 = arith.constant dense<0.000000e+00> : vector<2x512xf32>
    %307 = tpu.matmul %304, %128, %cst_152 {dimension_numbers = #tpu.dot_dimension_numbers<[1], [0], [0], [1], [0, 0, 1, 1], [], []>} : vector<2x128xf32>, vector<128x512xf32>, vector<2x512xf32> -> vector<2x512xf32>
    %308 = arith.addf %306, %307 : vector<2x512xf32>
    %309 = vector.extract_strided_slice %308 {offsets = [0, 0], sizes = [2, 256], strides = [1, 1]} : vector<2x512xf32> to vector<2x256xf32>
    %310 = arith.negf %309 : vector<2x256xf32>
    %311 = math.exp %310 : vector<2x256xf32>
    %cst_153 = arith.constant 1.000000e+00 : f32
    %312 = vector.broadcast %cst_153 : f32 to vector<2x256xf32>
    %313 = arith.addf %312, %311 : vector<2x256xf32>
    %314 = arith.divf %312, %313 : vector<2x256xf32>
    %315 = vector.extract_strided_slice %314 {offsets = [0, 0], sizes = [2, 128], strides = [1, 1]} : vector<2x256xf32> to vector<2x128xf32>
    %316 = vector.extract_strided_slice %314 {offsets = [0, 128], sizes = [2, 128], strides = [1, 1]} : vector<2x256xf32> to vector<2x128xf32>
    %317 = vector.extract_strided_slice %308 {offsets = [0, 256], sizes = [2, 128], strides = [1, 1]} : vector<2x512xf32> to vector<2x128xf32>
    %318 = math.tanh %317 : vector<2x128xf32>
    %319 = vector.extract_strided_slice %308 {offsets = [0, 384], sizes = [2, 128], strides = [1, 1]} : vector<2x512xf32> to vector<2x128xf32>
    %320 = arith.negf %319 : vector<2x128xf32>
    %321 = math.exp %320 : vector<2x128xf32>
    %cst_154 = arith.constant 1.000000e+00 : f32
    %322 = vector.broadcast %cst_154 : f32 to vector<2x128xf32>
    %323 = arith.addf %322, %321 : vector<2x128xf32>
    %324 = arith.divf %322, %323 : vector<2x128xf32>
    %325 = arith.mulf %316, %302 : vector<2x128xf32>
    %326 = arith.mulf %315, %318 : vector<2x128xf32>
    %327 = arith.addf %325, %326 : vector<2x128xf32>
    %328 = math.tanh %327 : vector<2x128xf32>
    %329 = arith.mulf %324, %328 : vector<2x128xf32>
    %330 = math.tanh %329 : vector<2x128xf32>
    %331 = tpu.iota {dimensions = array<i32: 1>} : vector<2x128xi32>
    %c32_i32 = arith.constant 32 : i32
    %332 = vector.broadcast %c32_i32 : i32 to vector<2x128xi32>
    %333 = arith.cmpi slt, %331, %332 : vector<2x128xi32>
    %334 = arith.select %333, %155, %330 : vector<2x128xi1>, vector<2x128xf32>
    %c0_155 = arith.constant 0 : index
    %c0_156 = arith.constant 0 : index
    %335 = vector.load %arg12[%c0_155, %c0_156] : memref<16x128xf32, #tpu.memory_space<vmem>>, vector<2x128xf32>
    tpu.vector_store %arg12[%c0_155, %c0_156], %334 {strides = array<i32>} : memref<16x128xf32, #tpu.memory_space<vmem>>, vector<2x128xf32>,
    %336 = arith.select %333, %180, %305 : vector<2x128xi1>, vector<2x128xf32>
    %c2_157 = arith.constant 2 : index
    %c0_158 = arith.constant 0 : index
    %337 = vector.load %arg12[%c2_157, %c0_158] : memref<16x128xf32, #tpu.memory_space<vmem>>, vector<2x128xf32>
    tpu.vector_store %arg12[%c2_157, %c0_158], %336 {strides = array<i32>} : memref<16x128xf32, #tpu.memory_space<vmem>>, vector<2x128xf32>,
    %338 = arith.select %333, %205, %280 : vector<2x128xi1>, vector<2x128xf32>
    %c4_159 = arith.constant 4 : index
    %c0_160 = arith.constant 0 : index
    %339 = vector.load %arg12[%c4_159, %c0_160] : memref<16x128xf32, #tpu.memory_space<vmem>>, vector<2x128xf32>
    tpu.vector_store %arg12[%c4_159, %c0_160], %338 {strides = array<i32>} : memref<16x128xf32, #tpu.memory_space<vmem>>, vector<2x128xf32>,
    %340 = arith.select %333, %230, %255 : vector<2x128xi1>, vector<2x128xf32>
    %c6_161 = arith.constant 6 : index
    %c0_162 = arith.constant 0 : index
    %341 = vector.load %arg12[%c6_161, %c0_162] : memref<16x128xf32, #tpu.memory_space<vmem>>, vector<2x128xf32>
    tpu.vector_store %arg12[%c6_161, %c0_162], %340 {strides = array<i32>} : memref<16x128xf32, #tpu.memory_space<vmem>>, vector<2x128xf32>,
    %342 = arith.select %333, %255, %230 : vector<2x128xi1>, vector<2x128xf32>
    %c8_163 = arith.constant 8 : index
    %c0_164 = arith.constant 0 : index
    %343 = vector.load %arg12[%c8_163, %c0_164] : memref<16x128xf32, #tpu.memory_space<vmem>>, vector<2x128xf32>
    tpu.vector_store %arg12[%c8_163, %c0_164], %342 {strides = array<i32>} : memref<16x128xf32, #tpu.memory_space<vmem>>, vector<2x128xf32>,
    %344 = arith.select %333, %280, %205 : vector<2x128xi1>, vector<2x128xf32>
    %c10_165 = arith.constant 10 : index
    %c0_166 = arith.constant 0 : index
    %345 = vector.load %arg12[%c10_165, %c0_166] : memref<16x128xf32, #tpu.memory_space<vmem>>, vector<2x128xf32>
    tpu.vector_store %arg12[%c10_165, %c0_166], %344 {strides = array<i32>} : memref<16x128xf32, #tpu.memory_space<vmem>>, vector<2x128xf32>,
    %346 = arith.select %333, %305, %180 : vector<2x128xi1>, vector<2x128xf32>
    %c12_167 = arith.constant 12 : index
    %c0_168 = arith.constant 0 : index
    %347 = vector.load %arg12[%c12_167, %c0_168] : memref<16x128xf32, #tpu.memory_space<vmem>>, vector<2x128xf32>
    tpu.vector_store %arg12[%c12_167, %c0_168], %346 {strides = array<i32>} : memref<16x128xf32, #tpu.memory_space<vmem>>, vector<2x128xf32>,
    %348 = arith.select %333, %330, %155 : vector<2x128xi1>, vector<2x128xf32>
    %c14_169 = arith.constant 14 : index
    %c0_170 = arith.constant 0 : index
    %349 = vector.load %arg12[%c14_169, %c0_170] : memref<16x128xf32, #tpu.memory_space<vmem>>, vector<2x128xf32>
    tpu.vector_store %arg12[%c14_169, %c0_170], %348 {strides = array<i32>} : memref<16x128xf32, #tpu.memory_space<vmem>>, vector<2x128xf32>,
    %c0_171 = arith.constant 0 : index
    %c0_172 = arith.constant 0 : index
    %350 = vector.load %arg12[%c0_171, %c0_172] : memref<16x128xf32, #tpu.memory_space<vmem>>, vector<16x128xf32>
    %c0_173 = arith.constant 0 : index
    %c0_174 = arith.constant 0 : index
    %351 = vector.load %arg4[%c0_173, %c0_174] : memref<128x128xf32, #tpu.memory_space<vmem>>, vector<128x128xf32>
    %cst_175 = arith.constant dense<0.000000e+00> : vector<16x128xf32>
    %352 = tpu.matmul %350, %351, %cst_175 {dimension_numbers = #tpu.dot_dimension_numbers<[1], [0], [0], [1], [0, 0, 1, 1], [], []>} : vector<16x128xf32>, vector<128x128xf32>, vector<16x128xf32> -> vector<16x128xf32>
    %c0_176 = arith.constant 0 : index
    %c0_177 = arith.constant 0 : index
    %353 = vector.load %arg5[%c0_176, %c0_177] : memref<1x128xf32, #tpu.memory_space<vmem>>, vector<1x128xf32>
    %354 = vector.broadcast %353 : vector<1x128xf32> to vector<16x128xf32>
    %355 = arith.addf %352, %354 : vector<16x128xf32>
    %356 = vector.extract_strided_slice %355 {offsets = [0, 0], sizes = [2, 128], strides = [1, 1]} : vector<16x128xf32> to vector<2x128xf32>
    %357 = vector.extract_strided_slice %355 {offsets = [2, 0], sizes = [2, 128], strides = [1, 1]} : vector<16x128xf32> to vector<2x128xf32>
    %358 = vector.extract_strided_slice %355 {offsets = [4, 0], sizes = [2, 128], strides = [1, 1]} : vector<16x128xf32> to vector<2x128xf32>
    %359 = vector.extract_strided_slice %355 {offsets = [6, 0], sizes = [2, 128], strides = [1, 1]} : vector<16x128xf32> to vector<2x128xf32>
    %360 = vector.extract_strided_slice %355 {offsets = [8, 0], sizes = [2, 128], strides = [1, 1]} : vector<16x128xf32> to vector<2x128xf32>
    %361 = vector.extract_strided_slice %355 {offsets = [10, 0], sizes = [2, 128], strides = [1, 1]} : vector<16x128xf32> to vector<2x128xf32>
    %362 = vector.extract_strided_slice %355 {offsets = [12, 0], sizes = [2, 128], strides = [1, 1]} : vector<16x128xf32> to vector<2x128xf32>
    %363 = vector.extract_strided_slice %355 {offsets = [14, 0], sizes = [2, 128], strides = [1, 1]} : vector<16x128xf32> to vector<2x128xf32>
    %364 = arith.maximumf %356, %357 : vector<2x128xf32>
    %365 = arith.maximumf %364, %358 : vector<2x128xf32>
    %366 = arith.maximumf %365, %359 : vector<2x128xf32>
    %367 = arith.maximumf %366, %360 : vector<2x128xf32>
    %368 = arith.maximumf %367, %361 : vector<2x128xf32>
    %369 = arith.maximumf %368, %362 : vector<2x128xf32>
    %370 = arith.maximumf %369, %363 : vector<2x128xf32>
    %371 = arith.subf %356, %370 : vector<2x128xf32>
    %372 = math.exp %371 : vector<2x128xf32>
    %373 = arith.subf %357, %370 : vector<2x128xf32>
    %374 = math.exp %373 : vector<2x128xf32>
    %375 = arith.subf %358, %370 : vector<2x128xf32>
    %376 = math.exp %375 : vector<2x128xf32>
    %377 = arith.subf %359, %370 : vector<2x128xf32>
    %378 = math.exp %377 : vector<2x128xf32>
    %379 = arith.subf %360, %370 : vector<2x128xf32>
    %380 = math.exp %379 : vector<2x128xf32>
    %381 = arith.subf %361, %370 : vector<2x128xf32>
    %382 = math.exp %381 : vector<2x128xf32>
    %383 = arith.subf %362, %370 : vector<2x128xf32>
    %384 = math.exp %383 : vector<2x128xf32>
    %385 = arith.subf %363, %370 : vector<2x128xf32>
    %386 = math.exp %385 : vector<2x128xf32>
    %387 = arith.addf %372, %374 : vector<2x128xf32>
    %388 = arith.addf %387, %376 : vector<2x128xf32>
    %389 = arith.addf %388, %378 : vector<2x128xf32>
    %390 = arith.addf %389, %380 : vector<2x128xf32>
    %391 = arith.addf %390, %382 : vector<2x128xf32>
    %392 = arith.addf %391, %384 : vector<2x128xf32>
    %393 = arith.addf %392, %386 : vector<2x128xf32>
    %394 = arith.mulf %334, %372 : vector<2x128xf32>
    %395 = arith.mulf %336, %374 : vector<2x128xf32>
    %396 = arith.addf %394, %395 : vector<2x128xf32>
    %397 = arith.mulf %338, %376 : vector<2x128xf32>
    %398 = arith.addf %396, %397 : vector<2x128xf32>
    %399 = arith.mulf %340, %378 : vector<2x128xf32>
    %400 = arith.addf %398, %399 : vector<2x128xf32>
    %401 = arith.mulf %342, %380 : vector<2x128xf32>
    %402 = arith.addf %400, %401 : vector<2x128xf32>
    %403 = arith.mulf %344, %382 : vector<2x128xf32>
    %404 = arith.addf %402, %403 : vector<2x128xf32>
    %405 = arith.mulf %346, %384 : vector<2x128xf32>
    %406 = arith.addf %404, %405 : vector<2x128xf32>
    %407 = arith.mulf %348, %386 : vector<2x128xf32>
    %408 = arith.addf %406, %407 : vector<2x128xf32>
    %409 = tpu.reciprocal %393 : vector<2x128xf32> -> vector<2x128xf32>
    %410 = arith.mulf %408, %409 : vector<2x128xf32>
    %411 = math.tanh %410 : vector<2x128xf32>
    %c0_178 = arith.constant 0 : index
    %c0_179 = arith.constant 0 : index
    %412 = vector.load %arg6[%c0_178, %c0_179] : memref<128x32xf32, #tpu.memory_space<vmem>>, vector<128x32xf32>
    %cst_180 = arith.constant dense<0.000000e+00> : vector<2x32xf32>
    %413 = tpu.matmul %411, %412, %cst_180 {dimension_numbers = #tpu.dot_dimension_numbers<[1], [0], [0], [1], [0, 0, 1, 1], [], []>} : vector<2x128xf32>, vector<128x32xf32>, vector<2x32xf32> -> vector<2x32xf32>
    %c0_181 = arith.constant 0 : index
    %c0_182 = arith.constant 0 : index
    %414 = vector.load %arg7[%c0_181, %c0_182] : memref<1x32xf32, #tpu.memory_space<vmem>>, vector<1x32xf32>
    %415 = vector.broadcast %414 : vector<1x32xf32> to vector<2x32xf32>
    %416 = arith.addf %413, %415 : vector<2x32xf32>
    %c0_183 = arith.constant 0 : index
    %c0_184 = arith.constant 0 : index
    %417 = vector.load %arg8[%c0_183, %c0_184] : memref<32x4xf32, #tpu.memory_space<vmem>>, vector<32x4xf32>
    %cst_185 = arith.constant dense<0.000000e+00> : vector<2x4xf32>
    %418 = tpu.matmul %416, %417, %cst_185 {dimension_numbers = #tpu.dot_dimension_numbers<[1], [0], [0], [1], [0, 0, 1, 1], [], []>} : vector<2x32xf32>, vector<32x4xf32>, vector<2x4xf32> -> vector<2x4xf32>
    %c0_186 = arith.constant 0 : index
    %c0_187 = arith.constant 0 : index
    %419 = vector.load %arg9[%c0_186, %c0_187] : memref<1x4xf32, #tpu.memory_space<vmem>>, vector<1x4xf32>
    %420 = vector.broadcast %419 : vector<1x4xf32> to vector<2x4xf32>
    %421 = arith.addf %418, %420 : vector<2x4xf32>
    %c0_188 = arith.constant 0 : index
    %c0_189 = arith.constant 0 : index
    %422 = vector.load %arg10[%c0_188, %c0_189] : memref<2x4xf32, #tpu.memory_space<vmem>>, vector<2x4xf32>
    tpu.vector_store %arg10[%c0_188, %c0_189], %421 {strides = array<i32>} : memref<2x4xf32, #tpu.memory_space<vmem>>, vector<2x4xf32>,
    return
  }
}

</mosaic_0001>

<bundles_post_ra>
// kernel: textrnn_attention_forward.1
= control target key start
LH: loop header
LB: loop body
LE: loop exit
PB: predicated region body
PF: predicated region fallthrough
CT: control target
= control target key end

     0   :  { %15 = vsyncpa [#allocation7], 0  ;;  %s4516_s0 = inlined_call_operand.vmem [shape: s32[2,8], index: 0, kind: input, shape index: {}]   ;;  %s4517_s1 = inlined_call_operand.hbm [shape: f32[50,512], index: 1, kind: input, shape index: {}]   ;;  %s4518_s2 = inlined_call_operand.hbm [shape: f32[50,512], index: 2, kind: input, shape index: {}]   ;;  %s4519_s3 = inlined_call_operand.hbm [shape: f32[128,512], index: 3, kind: input, shape index: {}]   ;;  %s4520_s4 = inlined_call_operand.vmem [shape: f32[128,128], index: 4, kind: input, shape index: {}]   ;;  %s4521_s5 = inlined_call_operand.vmem [shape: f32[1,128], index: 5, kind: input, shape index: {}]   ;;  %s4522_s6 = inlined_call_operand.vmem [shape: f32[128,32], index: 6, kind: input, shape index: {}]   ;;  %s4523_s7 = inlined_call_operand.vmem [shape: f32[1,32], index: 7, kind: input, shape index: {}]   ;;  %s4524_s8 = inlined_call_operand.vmem [shape: f32[32,4], index: 8, kind: input, shape index: {}]   ;;  %s4525_s9 = inlined_call_operand.vmem [shape: f32[1,4], index: 9, kind: input, shape index: {}]   ;;  %s4526_s10 = inlined_call_operand.hbm [shape: f32[2,4], index: 10, kind: output, shape index: {}]  }
   0x1   :  { %16 = vsyncpa [#allocation5], 0 }
   0x2   :  { %17 = vsyncpa [#allocation10], 0 }
   0x3   :  { %18 = vsyncpa [#allocation6], 0  ;;  %s25_s15 = sshll.u32 %s4516_s0, 4  ;;  %s3729_s16 = smov [#allocation9]   ;;  %s26_s15 = int_to_ptr.vmem [resolvable:$true] %s25_s15 }
   0x4   :  { %s46_s17 = sshll.u32 %s3729_s16, 4  ;;  %s3621_s20 = scalar_lea.hbm %s4518_s2, 3584  ;;  %s47_s17 = int_to_ptr.vmem [resolvable:$true] %s46_s17 }
   0x5   :  { %p3622_p0 = scmp.ne.s32.totalorder %s4518_s2, %s3621_s20  ;;  %p3625_p1 = scmp.lt.u32.totalorder %s3621_s20, %s4518_s2 }
   0x7   :  { %p3627_p2 = pnand %p3625_p1, %p3622_p0 }
   0x9   :  { %3630 = shalt.err (!%p3627_p2)
}
   0xa   :  { %s3631_s25 = scalar_lea.vmem %s47_s17, 3584  ;;  %p3636_p4 = scmp.lt.s32.totalorder %s47_s17, %s47_s17 }
   0xb   :  { %p3632_p3 = scmp.ne.s32.totalorder %s47_s17, %s3631_s25  ;;  %p3637_p5 = scmp.lt.s32.totalorder %s3631_s25, %s3631_s25 }
   0xd   :  { %p3638_p6 = por %p3637_p5, %p3636_p4 }
   0xf   :  { %p3639_p7 = pnand %p3638_p6, %p3632_p3 }
  0x11   :  { %3642 = shalt.err (!%p3639_p7)
}
  0x12   :  { %s3730_s0 = smov 512   ;;  %s3731_s26 = smov 32  }
  0x13   :  { %52 = dma.hbm_to_vmem [thread:$0]  %s4518_s2, 3584, %s47_s17, [#allocation10], %s3730_s0, %s3730_s0, %s3731_s26  }
  0x14   :  { %s3643_s29 = scalar_lea.vmem %s26_s15, 32  ;;  %p3648_p9 = scmp.lt.s32.totalorder %s26_s15, %s26_s15 }
  0x15   :  { %p3644_p8 = scmp.ne.s32.totalorder %s26_s15, %s3643_s29  ;;  %p3649_p10 = scmp.lt.s32.totalorder %s3643_s29, %s3643_s29 }
  0x17   :  { %p3650_p11 = por %p3649_p10, %p3648_p9 }
  0x19   :  { %p3651_p12 = pnand %p3650_p11, %p3644_p8 }
  0x1b   :  { %3654 = shalt.err (!%p3651_p12)
}
  0x1c   :  { %s3732_s30 = smov [#allocation4]   ;;  %s3733_s11 = smov [#allocation8]  }
  0x1d   :  { %28 = dma.vmem_to_smem %s26_s15, 32, %s3732_s30, [#allocation7]  }
  0x1e   :  { %s34_s12 = sshll.u32 %s3733_s11, 4  ;;  %s3734_s13 = smov [#allocation11]   ;;  %s35_s12 = int_to_ptr.vmem [resolvable:$true] %s34_s12 }
  0x1f   :  { %s58_s14 = sshll.u32 %s3734_s13, 4  ;;  %s3655_s2 = scalar_lea.hbm %s4517_s1, 3584  ;;  %s3812_s14 = int_to_ptr.vmem [resolvable:$true] %s58_s14 }
  0x20   :  { %p3656_p13 = scmp.ne.s32.totalorder %s4517_s1, %s3655_s2  ;;  %p3659_p0 = scmp.lt.u32.totalorder %s3655_s2, %s4517_s1 }
  0x22   :  { %p3661_p1 = pnand %p3659_p0, %p3656_p13 }
  0x24   :  { %3664 = shalt.err (!%p3661_p1)
}
  0x25   :  { %s3665_s15 = scalar_lea.vmem %s35_s12, 3584  ;;  %p3670_p3 = scmp.lt.s32.totalorder %s35_s12, %s35_s12 }
  0x26   :  { %p3666_p2 = scmp.ne.s32.totalorder %s35_s12, %s3665_s15  ;;  %p3671_p4 = scmp.lt.s32.totalorder %s3665_s15, %s3665_s15 }
  0x28   :  { %p3672_p5 = por %p3671_p4, %p3670_p3 }
  0x2a   :  { %p3673_p6 = pnand %p3672_p5, %p3666_p2 }
  0x2c   :  { %3676 = shalt.err (!%p3673_p6)
}
  0x2d   :  { %40 = dma.hbm_to_vmem [thread:$0]  %s4517_s1, 3584, %s35_s12, [#allocation5], %s3730_s0, %s3730_s0, %s3731_s26  }
  0x2e   :  { %s3677_s27 = scalar_lea.hbm %s4519_s3, 8192 }
  0x2f   :  { %p3678_p7 = scmp.ne.s32.totalorder %s4519_s3, %s3677_s27  ;;  %p3681_p8 = scmp.lt.u32.totalorder %s3677_s27, %s4519_s3 }
  0x31   :  { %p3683_p9 = pnand %p3681_p8, %p3678_p7 }
  0x33   :  { %3686 = shalt.err (!%p3683_p9)
}
  0x34   :  { %s3687_s13 = scalar_lea.vmem %s3812_s14, 8192  ;;  %p3692_p11 = scmp.lt.s32.totalorder %s3812_s14, %s3812_s14 }
  0x35   :  { %p3688_p10 = scmp.ne.s32.totalorder %s3812_s14, %s3687_s13  ;;  %p3693_p12 = scmp.lt.s32.totalorder %s3687_s13, %s3687_s13 }
  0x37   :  { %p3694_p13 = por %p3693_p12, %p3692_p11 }
  0x39   :  { %p3695_p0 = pnand %p3694_p13, %p3688_p10 }
  0x3b   :  { %3698 = shalt.err (!%p3695_p0)
}
  0x3c   :  { %64 = dma.hbm_to_vmem [thread:$0]  %s4519_s3, 8192, %s3812_s14, [#allocation10], %s3730_s0, %s3730_s0, %s3731_s26  }
  0x3d   :  { %3721 = dma.done.wait [#allocation7], 32  }
  0x3e   :  { %3722 = vsyncadd [#allocation7], 4294967264 }
  0x3f   :  { %3723 = dma.done.wait [#allocation5], 3584  }
  0x40   :  { %3724 = vsyncadd [#allocation5], 4294963712 }
  0x41   :  { %3725 = dma.done.wait [#allocation10], 11776  }
  0x42   :  { %3726 = vsyncadd [#allocation10], 4294955520 }
  0x43   :  { %89 = sfence }
  0x44   :  { %v478_v0 = vld [vmem:[#allocation11 + $0x8] sm:$0xff]  ;;  %v477_v2 = vld [vmem:[#allocation11] sm:$0xff]  ;;  %s3849_s16 = sld [smem:[#allocation4]]  ;;  %v3735_v7 = vmov 0.0   ;;  %s3855_s3 = sld [smem:[#allocation4 + $0x7]]  ;;  %v480_v19 = vld [vmem:[#allocation11 + $0x18] sm:$0xff]  ;;  %v111_v63 = vlaneseq }
  0x45   :  { %v482_v1 = vld [vmem:[#allocation11 + $0x28] sm:$0xff]  ;;  %v481_v4 = vld [vmem:[#allocation11 + $0x20] sm:$0xff]  ;;  %609 = vmatprep.mubr.f32.mxu0 %v3735_v7  ;;  %680 = vmatprep.mubr.f32.mxu1 %v3735_v7  ;;  %s3861_s0 = sld [smem:[#allocation4 + $0x80]]  ;;  %s3867_s26 = sld [smem:[#allocation4 + $0x87]]  ;;  %v484_v20 = vld [vmem:[#allocation11 + $0x38] sm:$0xff]  ;;  %vm3737_vm2 = vmmov 0  }
  0x46   :  { %v3851_v3 = vpack.c.bf16 %v482_v1, %v478_v0  ;;  %v486_v5 = vld [vmem:[#allocation11 + $0x48] sm:$0xff]  ;;  %v3857_v8 = vpack.c.bf16 %v481_v4, %v477_v2  ;;  %v485_v10 = vld [vmem:[#allocation11 + $0x40] sm:$0xff]  ;;  %v3872_v22 = vpack.c.bf16 %v484_v20, %v480_v19  ;;  %v479_v23 = vld [vmem:[#allocation11 + $0x10] sm:$0xff]  ;;  %vm3946_vm0 = vcmp.lt.s32.totalorder %v111_v63, 512 }
  0x47   :  { %v490_v6 = vld [vmem:[#allocation11 + $0x68] sm:$0xff]  ;;  %v489_v11 = vld [vmem:[#allocation11 + $0x60] sm:$0xff]  ;;  %v483_v24 = vld [vmem:[#allocation11 + $0x30] sm:$0xff]  ;;  %vm2409_vm3 = vcmask 261120   ;;  %vm2483_vm4 = vcmask 25600  }
  0x48   :  { %v3859_v9 = vpack.c.bf16 %v490_v6, %v486_v5  ;;  %v494_v12 = vld [vmem:[#allocation11 + $0x88] sm:$0xff]  ;;  %2874 = vmatprep.subr.bf16.mxu0 %v3851_v3  ;;  %v3865_v14 = vpack.c.bf16 %v489_v11, %v485_v10  ;;  %v493_v15 = vld [vmem:[#allocation11 + $0x80] sm:$0xff]  ;;  %v3874_v25 = vpack.c.bf16 %v483_v24, %v479_v23  ;;  %2906 = vmatprep.subr.bf16.mxu1 %v3872_v22  ;;  %v488_v27 = vld [vmem:[#allocation11 + $0x58] sm:$0xff] }
  0x49   :  { %v498_v13 = vld [vmem:[#allocation11 + $0xa8] sm:$0xff]  ;;  %2876 = vmatpush1.bf16.msra.mxu0 %v3857_v8  ;;  %v497_v16 = vld [vmem:[#allocation11 + $0xa0] sm:$0xff]  ;;  %v492_v28 = vld [vmem:[#allocation11 + $0x78] sm:$0xff] }
  0x4a   :  { %2878 = vmatprep.subr.bf16.mxu0 %v3859_v9  ;;  %v3870_v17 = vpack.c.bf16 %v498_v13, %v494_v12  ;;  %v502_v18 = vld [vmem:[#allocation11 + $0xc8] sm:$0xff]  ;;  %v3877_v26 = vpack.c.bf16 %v497_v16, %v493_v15  ;;  %v487_v29 = vld [vmem:[#allocation11 + $0x50] sm:$0xff]  ;;  %s92_s14 = sshra.s32 %s3849_s16, 3  ;;  %v501_v31 = vld [vmem:[#allocation11 + $0xc0] sm:$0xff]  ;;  %2908 = vmatpush1.bf16.msra.mxu1 %v3874_v25  ;;  %v3885_v33 = vpack.c.bf16 %v492_v28, %v488_v27  ;;  %s101_s18 = sshra.s32 %s3855_s3, 3 }
  0x4b   :  { %v506_v21 = vld [vmem:[#allocation11 + $0xe8] sm:$0xff]  ;;  %v505_v32 = vld [vmem:[#allocation11 + $0xe0] sm:$0xff]  ;;  %v491_v34 = vld [vmem:[#allocation11 + $0x70] sm:$0xff]  ;;  %s95_s2 = sand.u32 7, %s3849_s16  ;;  %s119_s17 = sshra.s32 %s3861_s0, 3 }
  0x4c   :  { %v3882_v30 = vpack.c.bf16 %v506_v21, %v502_v18  ;;  %v510_v35 = vld [vmem:[#allocation11 + $0x108] sm:$0xff]  ;;  %v3888_v37 = vpack.c.bf16 %v491_v34, %v487_v29  ;;  %v496_v38 = vld [vmem:[#allocation11 + $0x98] sm:$0xff]  ;;  %2910 = vmatprep.subr.bf16.mxu1 %v3885_v33  ;;  %v495_v40 = vld [vmem:[#allocation11 + $0x90] sm:$0xff]  ;;  %s2720_s19 = sshll.u32 %s92_s14, 5  ;;  %s104_s20 = sand.u32 7, %s3855_s3  ;;  %v3895_v42 = vpack.c.bf16 %v505_v32, %v501_v31 }
  0x4d   :  { %2880 = vmatpush1.bf16.msra.mxu0 %v3865_v14  ;;  %v514_v36 = vld [vmem:[#allocation11 + $0x128] sm:$0xff]  ;;  %v500_v39 = vld [vmem:[#allocation11 + $0xb8] sm:$0xff]  ;;  %v499_v41 = vld [vmem:[#allocation11 + $0xb0] sm:$0xff]  ;;  %s2721_s21 = sshll.u32 %s101_s18, 5  ;;  %s128_s15 = sshra.s32 %s3867_s26, 3 }
  0x4e   :  { %2882 = vmatprep.subr.bf16.mxu0 %v3870_v17  ;;  %v509_v43 = vld [vmem:[#allocation11 + $0x100] sm:$0xff]  ;;  %v3897_v45 = vpack.c.bf16 %v500_v39, %v496_v38  ;;  %v3901_v46 = vpack.c.bf16 %v514_v36, %v510_v35  ;;  %2912 = vmatpush1.bf16.msra.mxu1 %v3888_v37  ;;  %v518_v47 = vld [vmem:[#allocation11 + $0x148] sm:$0xff]  ;;  %v3904_v48 = vpack.c.bf16 %v499_v41, %v495_v40  ;;  %v504_v49 = vld [vmem:[#allocation11 + $0xd8] sm:$0xff]  ;;  %s122_s22 = sand.u32 7, %s3861_s0  ;;  %s2722_s23 = sshll.u32 %s119_s17, 5 }
  0x4f   :  { %v513_v44 = vld [vmem:[#allocation11 + $0x120] sm:$0xff]  ;;  %v508_v50 = vld [vmem:[#allocation11 + $0xf8] sm:$0xff]  ;;  %v522_v51 = vld [vmem:[#allocation11 + $0x168] sm:$0xff]  ;;  %s131_s24 = sand.u32 7, %s3867_s26  ;;  %s2723_s25 = sshll.u32 %s128_s15, 5 }
  0x50   :  { %2914 = vmatprep.subr.bf16.mxu1 %v3897_v45  ;;  %v3908_v52 = vpack.c.bf16 %v508_v50, %v504_v49  ;;  %v503_v53 = vld [vmem:[#allocation11 + $0xd0] sm:$0xff]  ;;  %s3913_s27 = sadd.s32 %s2720_s19, %s95_s2  ;;  %v3916_v55 = vpack.c.bf16 %v513_v44, %v509_v43  ;;  %v512_v56 = vld [vmem:[#allocation11 + $0x118] sm:$0xff]  ;;  %s3920_s28 = sadd.s32 %s2721_s21, %s104_s20  ;;  %v3925_v58 = vpack.c.bf16 %v522_v51, %v518_v47  ;;  %v517_v59 = vld [vmem:[#allocation11 + $0x140] sm:$0xff] }
  0x51   :  { %2884 = vmatpush1.bf16.msra.mxu0 %v3877_v26  ;;  %v507_v54 = vld [vmem:[#allocation11 + $0xf0] sm:$0xff]  ;;  %v516_v57 = vld [vmem:[#allocation11 + $0x138] sm:$0xff]  ;;  %s3922_s29 = sadd.s32 %s2722_s23, %s122_s22  ;;  %v521_v60 = vld [vmem:[#allocation11 + $0x160] sm:$0xff]  ;;  %s3930_s30 = sadd.s32 %s2723_s25, %s131_s24 }
  0x52   :  { %2886 = vmatprep.subr.bf16.mxu0 %v3882_v30  ;;  %2916 = vmatpush1.bf16.msra.mxu1 %v3904_v48  ;;  %v526_v61 = vld [vmem:[#allocation11 + $0x188] sm:$0xff]  ;;  %v3928_v62 = vpack.c.bf16 %v507_v54, %v503_v53  ;;  %v3933_v1 = vpack.c.bf16 %v516_v57, %v512_v56  ;;  %v511_v2 = vld [vmem:[#allocation11 + $0x110] sm:$0xff]  ;;  %v525_v5 = vld [vmem:[#allocation11 + $0x180] sm:$0xff]  ;;  %v3936_v11 = vpack.c.bf16 %v521_v60, %v517_v59  ;;  %s99_s11 = scalar_lea.vmem [#allocation8], %s3913_s27  ;;  %s108_s13 = scalar_lea.vmem [#allocation9], %s3920_s28 }
  0x53   :  { %v530_v0 = vld [vmem:[#allocation11 + $0x1a8] sm:$0xff]  ;;  %2918 = vmatprep.subr.bf16.mxu1 %v3908_v52  ;;  %v515_v4 = vld [vmem:[#allocation11 + $0x130] sm:$0xff]  ;;  %v520_v6 = vld [vmem:[#allocation11 + $0x158] sm:$0xff]  ;;  %s126_s1 = scalar_lea.vmem [#allocation8], %s3922_s29  ;;  %s135_s12 = scalar_lea.vmem [#allocation9], %s3930_s30 }
  0x54   :  { %v524_v10 = vld [vmem:[#allocation11 + $0x178] sm:$0xff]  ;;  %v529_v12 = vld [vmem:[#allocation11 + $0x1a0] sm:$0xff]  ;;  %v534_v13 = vld [vmem:[#allocation11 + $0x1c8] sm:$0xff]  ;;  %v3939_v16 = vpack.c.bf16 %v530_v0, %v526_v61  ;;  %v3942_v18 = vpack.c.bf16 %v515_v4, %v511_v2  ;;  %s2609_s16 = sld [smem:[#allocation4 + $0x1]]  ;;  %s2610_s3 = sld [smem:[#allocation4 + $0x6]] }
  0x55   :  { %2888 = vmatpush1.bf16.msra.mxu0 %v3895_v42  ;;  %v538_v15 = vld [vmem:[#allocation11 + $0x1e8] sm:$0xff]  ;;  %v519_v19 = vld [vmem:[#allocation11 + $0x150] sm:$0xff]  ;;  %v3951_v24 = vpack.c.bf16 %v524_v10, %v520_v6  ;;  %v528_v29 = vld [vmem:[#allocation11 + $0x198] sm:$0xff]  ;;  %v3957_v35 = vpack.c.bf16 %v529_v12, %v525_v5  ;;  %s2615_s0 = sld [smem:[#allocation4 + $0x81]]  ;;  %s2616_s26 = sld [smem:[#allocation4 + $0x86]] }
  0x56   :  { %2890 = vmatprep.subr.bf16.mxu0 %v3901_v46  ;;  %2920 = vmatpush1.bf16.msra.mxu1 %v3928_v62  ;;  %v523_v20 = vld [vmem:[#allocation11 + $0x170] sm:$0xff]  ;;  %v532_v31 = vld [vmem:[#allocation11 + $0x1b8] sm:$0xff]  ;;  %v3960_v38 = vpack.c.bf16 %v538_v15, %v534_v13  ;;  %v533_v39 = vld [vmem:[#allocation11 + $0x1c0] sm:$0xff] }
  0x57   :  { %v100_v21 = vld [vmem:[%s99_s11] ss:$8 sm:$0xf]  ;;  %2922 = vmatprep.subr.bf16.mxu1 %v3933_v1  ;;  %v3963_v41 = vpack.c.bf16 %v523_v20, %v519_v19  ;;  %v3968_v43 = vpack.c.bf16 %v532_v31, %v528_v29 }
  0x58   :  { %v109_v27 = vld [vmem:[%s108_s13] ss:$8 sm:$0xf] }
  0x59   :  { %2892 = vmatpush1.bf16.msra.mxu0 %v3916_v55  ;;  %v127_v28 = vld [vmem:[%s126_s1] ss:$8 sm:$0xf]  ;;  %v110_v32 = vadd.f32 %v109_v27, %v100_v21 }
  0x5a   :  { %2894 = vmatprep.subr.bf16.mxu0 %v3925_v58  ;;  %v136_v34 = vld [vmem:[%s135_s12] ss:$8 sm:$0xf]  ;;  %2924 = vmatpush1.bf16.msra.mxu1 %v3942_v18  ;;  %s143_s14 = sshra.s32 %s2609_s16, 3  ;;  %s146_s18 = sand.u32 7, %s2609_s16 }
  0x5b   :  { %v137_v36 = vadd.f32 %v136_v34, %v127_v28  ;;  %v537_v40 = vld [vmem:[#allocation11 + $0x1e0] sm:$0xff]  ;;  %115 = vst.msk [vmem:[#allocation2] ss:$8 sm:$0xf] %vm3946_vm0, %v110_v32  ;;  %2926 = vmatprep.subr.bf16.mxu1 %v3951_v24  ;;  %v527_v44 = vld [vmem:[#allocation11 + $0x190] sm:$0xff]  ;;  %v536_v49 = vld [vmem:[#allocation11 + $0x1d8] sm:$0xff] }
  0x5c   :  { %v531_v47 = vld [vmem:[#allocation11 + $0x1b0] sm:$0xff]  ;;  %v540_v50 = vld [vmem:[#allocation11 + $0x1f8] sm:$0xff]  ;;  %v3973_v51 = vpack.c.bf16 %v537_v40, %v533_v39  ;;  %s2724_s2 = sshll.u32 %s143_s14, 5  ;;  %s152_s17 = sshra.s32 %s2610_s3, 3 }
  0x5d   :  { %2896 = vmatpush1.bf16.msra.mxu0 %v3936_v11  ;;  %139 = vst.msk [vmem:[#allocation2 + $0x1] ss:$8 sm:$0xf] %vm3946_vm0, %v137_v36  ;;  %v3977_v53 = vpack.c.bf16 %v531_v47, %v527_v44  ;;  %v3980_v54 = vpack.c.bf16 %v540_v50, %v536_v49  ;;  %v535_v56 = vld [vmem:[#allocation11 + $0x1d0] sm:$0xff]  ;;  %s149_s19 = sadd.s32 %s2724_s2, %s146_s18  ;;  %s155_s20 = sand.u32 7, %s2610_s3 }
  0x5e   :  { %2898 = vmatprep.subr.bf16.mxu0 %v3939_v16  ;;  %2928 = vmatpush1.bf16.msra.mxu1 %v3963_v41  ;;  %v539_v57 = vld [vmem:[#allocation11 + $0x1f0] sm:$0xff]  ;;  %s2725_s21 = sshll.u32 %s152_s17, 5  ;;  %s150_s15 = scalar_lea.vmem [#allocation8], %s149_s19 }
  0x5f   :  { %2930 = vmatprep.subr.bf16.mxu1 %v3968_v43  ;;  %v3984_v59 = vpack.c.bf16 %v539_v57, %v535_v56  ;;  %v151_v60 = vld [vmem:[%s150_s15] ss:$8 sm:$0xf]  ;;  %s158_s22 = sadd.s32 %s2725_s21, %s155_s20  ;;  %s167_s23 = sshra.s32 %s2615_s0, 3 }
  0x60   :  { %s170_s24 = sand.u32 7, %s2615_s0  ;;  %s159_s25 = scalar_lea.vmem [#allocation9], %s158_s22 }
  0x61   :  { %2900 = vmatpush1.bf16.msra.mxu0 %v3957_v35  ;;  %v160_v61 = vld [vmem:[%s159_s25] ss:$8 sm:$0xf]  ;;  %s2726_s27 = sshll.u32 %s167_s23, 5  ;;  %s176_s28 = sshra.s32 %s2616_s26, 3 }
  0x62   :  { %2902 = vmatprep.subr.bf16.mxu0 %v3960_v38  ;;  %2932 = vmatpush1.bf16.msra.mxu1 %v3977_v53  ;;  %v161_v0 = vadd.f32 %v160_v61, %v151_v60  ;;  %s173_s29 = sadd.s32 %s2726_s27, %s170_s24  ;;  %s179_s30 = sand.u32 7, %s2616_s26 }
  0x63   :  { %2934 = vmatprep.subr.bf16.mxu1 %v3980_v54  ;;  %s2727_s11 = sshll.u32 %s176_s28, 5  ;;  %s174_s13 = scalar_lea.vmem [#allocation8], %s173_s29 }
  0x64   :  { %163 = vst.msk [vmem:[#allocation2 + $0x2] ss:$8 sm:$0xf] %vm3946_vm0, %v161_v0  ;;  %v175_v2 = vld [vmem:[%s174_s13] ss:$8 sm:$0xf]  ;;  %s182_s1 = sadd.s32 %s2727_s11, %s179_s30 }
  0x65   :  { %2904 = vmatpush1.bf16.msra.mxu0 %v3973_v51  ;;  %s183_s12 = scalar_lea.vmem [#allocation9], %s182_s1  ;;  %v541_v6 = vld [vmem:[#allocation2] sm:$0x3]  ;;  %v542_v10 = vld [vmem:[#allocation2 + $0x8] sm:$0x3]  ;;  %s2621_s16 = sld [smem:[#allocation4 + $0x2]] }
  0x66   :  { %2938 = vmatprep.subr.bf16.mxu0 %v3851_v3  ;;  %2936 = vmatpush1.bf16.msra.mxu1 %v3984_v59  ;;  %v184_v4 = vld [vmem:[%s183_s12] ss:$8 sm:$0xf]  ;;  %s2622_s3 = sld [smem:[#allocation4 + $0x5]]  ;;  %s2627_s0 = sld [smem:[#allocation4 + $0x82]] }
  0x67   :  { %2970 = vmatprep.subr.bf16.mxu1 %v3872_v22  ;;  %v185_v5 = vadd.f32 %v184_v4, %v175_v2  ;;  %v544_v27 = vld [vmem:[#allocation2 + $0x18] sm:$0x3]  ;;  %v543_v32 = vld [vmem:[#allocation2 + $0x10] sm:$0x3]  ;;  %s2628_s26 = sld [smem:[#allocation4 + $0x85]] }
  0x68   :  { %610 = vmatmul.mubr.f32.vlgmr.msra.gmra.mrb[0].mxu0 %v3735_v7 }
  0x69   :  { %2940 = vmatpush1.bf16.msra.mxu0 %v3857_v8  ;;  %784 = vmatprep.mubr.f32.mxu0 %v3735_v7  ;;  %187 = vst.msk [vmem:[#allocation2 + $0x3] ss:$8 sm:$0xf] %vm3946_vm0, %v185_v5 }
  0x6a   :  { %2942 = vmatprep.subr.bf16.mxu0 %v3859_v9  ;;  %681 = vmatmul.mubr.f32.vlgmr.msra.gmra.mrb[0].mxu1 %v3735_v7 }
  0x6b   :  { %2972 = vmatpush1.bf16.msra.mxu1 %v3874_v25  ;;  %855 = vmatprep.mubr.f32.mxu1 %v3735_v7  ;;  %s191_s14 = sshra.s32 %s2621_s16, 3  ;;  %s194_s18 = sand.u32 7, %s2621_s16 }
  0x6c   :  { %2974 = vmatprep.subr.bf16.mxu1 %v3885_v33  ;;  %s2728_s2 = sshll.u32 %s191_s14, 5  ;;  %s200_s17 = sshra.s32 %s2622_s3, 3 }
  0x6d   :  { %2944 = vmatpush1.bf16.msra.mxu0 %v3865_v14  ;;  %s4071_s19 = sadd.s32 %s2728_s2, %s194_s18  ;;  %s203_s20 = sand.u32 7, %s2622_s3 }
  0x6e   :  { %2946 = vmatprep.subr.bf16.mxu0 %v3870_v17  ;;  %s2729_s21 = sshll.u32 %s200_s17, 5  ;;  %s198_s15 = scalar_lea.vmem [#allocation8], %s4071_s19 }
  0x6f   :  { %2976 = vmatpush1.bf16.msra.mxu1 %v3888_v37  ;;  %s4074_s22 = sadd.s32 %s2729_s21, %s203_s20  ;;  %s215_s23 = sshra.s32 %s2627_s0, 3 }
  0x70   :  { %2978 = vmatprep.subr.bf16.mxu1 %v3897_v45  ;;  %s218_s24 = sand.u32 7, %s2627_s0  ;;  %s207_s25 = scalar_lea.vmem [#allocation9], %s4074_s22 }
  0x71   :  { %2948 = vmatpush1.bf16.msra.mxu0 %v3877_v26  ;;  %s2730_s27 = sshll.u32 %s215_s23, 5  ;;  %s224_s28 = sshra.s32 %s2628_s26, 3 }
  0x72   :  { %2950 = vmatprep.subr.bf16.mxu0 %v3882_v30  ;;  %s4077_s29 = sadd.s32 %s2730_s27, %s218_s24  ;;  %s227_s30 = sand.u32 7, %s2628_s26 }
  0x73   :  { %2980 = vmatpush1.bf16.msra.mxu1 %v3904_v48  ;;  %s2731_s11 = sshll.u32 %s224_s28, 5  ;;  %s222_s13 = scalar_lea.vmem [#allocation8], %s4077_s29 }
  0x74   :  { %2982 = vmatprep.subr.bf16.mxu1 %v3908_v52  ;;  %s4082_s1 = sadd.s32 %s2731_s11, %s227_s30  ;;  %s2633_s16 = sld [smem:[#allocation4 + $0x3]] }
  0x75   :  { %2952 = vmatpush1.bf16.msra.mxu0 %v3895_v42  ;;  %s231_s12 = scalar_lea.vmem [#allocation9], %s4082_s1  ;;  %s2634_s3 = sld [smem:[#allocation4 + $0x4]] }
  0x76   :  { %2954 = vmatprep.subr.bf16.mxu0 %v3901_v46  ;;  %s2639_s0 = sld [smem:[#allocation4 + $0x83]]  ;;  %s2640_s26 = sld [smem:[#allocation4 + $0x84]] }
  0x77   :  { %2984 = vmatpush1.bf16.msra.mxu1 %v3928_v62 }
  0x78   :  { %2986 = vmatprep.subr.bf16.mxu1 %v3933_v1 }
  0x79   :  { %2956 = vmatpush1.bf16.msra.mxu0 %v3916_v55 }
  0x7a   :  { %2958 = vmatprep.subr.bf16.mxu0 %v3925_v58  ;;  %s239_s14 = sshra.s32 %s2633_s16, 3  ;;  %s242_s18 = sand.u32 7, %s2633_s16 }
  0x7b   :  { %2988 = vmatpush1.bf16.msra.mxu1 %v3942_v18  ;;  %s2732_s2 = sshll.u32 %s239_s14, 5  ;;  %s248_s17 = sshra.s32 %s2634_s3, 3 }
  0x7c   :  { %2990 = vmatprep.subr.bf16.mxu1 %v3951_v24  ;;  %s4128_s20 = sadd.s32 %s2732_s2, %s242_s18  ;;  %s251_s21 = sand.u32 7, %s2634_s3 }
  0x7d   :  { %2960 = vmatpush1.bf16.msra.mxu0 %v3936_v11  ;;  %s246_s23 = scalar_lea.vmem [#allocation8], %s4128_s20  ;;  %s266_s27 = sand.u32 7, %s2639_s0 }
  0x7e   :  { %2962 = vmatprep.subr.bf16.mxu0 %v3939_v16  ;;  %s272_s11 = sshra.s32 %s2640_s26, 3 }
  0x7f   :  { %2992 = vmatpush1.bf16.msra.mxu1 %v3963_v41  ;;  %s2735_s16 = sshll.u32 %s272_s11, 5 }
  0x80   :  { %2994 = vmatprep.subr.bf16.mxu1 %v3968_v43 }
  0x81   :  { %2964 = vmatpush1.bf16.msra.mxu0 %v3957_v35 }
  0x82   :  { %2966 = vmatprep.subr.bf16.mxu0 %v3960_v38 }
  0x83   :  { %2996 = vmatpush1.bf16.msra.mxu1 %v3977_v53 }
  0x84   :  { %2998 = vmatprep.subr.bf16.mxu1 %v3980_v54 }
  0x85   :  { %2968 = vmatpush1.bf16.msra.mxu0 %v3973_v51 }
  0x86   :  { %3002 = vmatprep.subr.bf16.mxu0 %v3851_v3 }
  0x87   :  { %3000 = vmatpush1.bf16.msra.mxu1 %v3984_v59 }
  0x88   :  { %3034 = vmatprep.subr.bf16.mxu1 %v3872_v22 }
 0x13b   :  { %v611_v12 = vpop.f32.mrb[0].mxu0 }
 0x13c   :  { %v687_v13 = vadd.f32 %v611_v12, %v541_v6  ;;  %v613_v15 = vpop.f32.mrb[1].mxu0  ;;  %v208_v12 = vld [vmem:[%s207_s25] ss:$8 sm:$0xf]  ;;  %s263_s25 = sshra.s32 %s2639_s0, 3 }
 0x13d   :  { %v688_v19 = vadd.f32 %v613_v15, %v542_v10  ;;  %v682_v28 = vpop.f32.mrb[0].mxu1  ;;  %v199_v10 = vld [vmem:[%s198_s15] ss:$8 sm:$0xf]  ;;  %s2733_s15 = sshll.u32 %s248_s17, 5  ;;  %s2734_s30 = sshll.u32 %s263_s25, 5 }
 0x13e   :  { %v2692_v20 = vmul.f32 -1.442695, %v687_v13  ;;  %v684_v29 = vpop.f32.mrb[1].mxu1  ;;  %v689_v36 = vadd.f32 %v682_v28, %v543_v32  ;;  %v209_v13 = vadd.f32 %v208_v12, %v199_v10  ;;  %v223_v15 = vld [vmem:[%s222_s13] ss:$8 sm:$0xf]  ;;  %s4131_s24 = sadd.s32 %s2733_s15, %s251_s21  ;;  %s4134_s13 = sadd.s32 %s2734_s30, %s266_s27 }
 0x13f   :  { %v2693_v21 = vmul.f32 -1.442695, %v688_v19  ;;  %v690_v31 = vadd.f32 %v684_v29, %v544_v27  ;;  %v232_v19 = vld [vmem:[%s231_s12] ss:$8 sm:$0xf]  ;;  %s255_s28 = scalar_lea.vmem [#allocation9], %s4131_s24 }
 0x140   :  { %3457 = vpow2.f32 %v2692_v20  ;;  %211 = vst.msk [vmem:[#allocation2 + $0x4] ss:$8 sm:$0xf] %vm3946_vm0, %v209_v13  ;;  %v233_v20 = vadd.f32 %v232_v19, %v223_v15  ;;  %s275_s12 = sand.u32 7, %s2640_s26  ;;  %s270_s3 = scalar_lea.vmem [#allocation8], %s4134_s13 }
 0x141   :  { %3459 = vpow2.f32 %v2693_v21  ;;  %v2694_v34 = vmul.f32 -1.442695, %v690_v31  ;;  %v716_v21 = vld [vmem:[#allocation2] sm:$0xc]  ;;  %v717_v31 = vld [vmem:[#allocation2 + $0x8] sm:$0xc]  ;;  %s4139_s14 = sadd.s32 %s2735_s16, %s275_s12 }
 0x142   :  { %235 = vst.msk [vmem:[#allocation2 + $0x5] ss:$8 sm:$0xf] %vm3946_vm0, %v233_v20  ;;  %s279_s18 = scalar_lea.vmem [#allocation9], %s4139_s14  ;;  %s294_s0 = scalar_lea.vmem [#allocation8], %s4131_s24 }
 0x143   :  { %3461 = vpow2.f32 %v2694_v34  ;;  %s303_s26 = scalar_lea.vmem [#allocation9], %s4128_s20  ;;  %s318_s2 = scalar_lea.vmem [#allocation8], %s4139_s14 }
 0x144   :  { %3463 = vtanh.f32 %v689_v36  ;;  %s327_s17 = scalar_lea.vmem [#allocation9], %s4134_s13  ;;  %s342_s20 = scalar_lea.vmem [#allocation8], %s4074_s22 }
 0x145   :  { %s351_s21 = scalar_lea.vmem [#allocation9], %s4071_s19  ;;  %s366_s15 = scalar_lea.vmem [#allocation8], %s4082_s1 }
 0x146   :  { %s2669_s19 = sld [smem:[#allocation4 + $0x6]]  ;;  %s2670_s22 = sld [smem:[#allocation4 + $0x1]] }
 0x147   :  { %s2676_s1 = sld [smem:[#allocation4 + $0x81]] }
 0x14a   :  { %v3458_v39 = vpop.eup %3457 }
 0x14b   :  { %v3460_v40 = vpop.eup %3459  ;;  %v697_v44 = vadd.f32 1.0, %v3458_v39 }
 0x14c   :  { %v698_v47 = vadd.f32 1.0, %v3460_v40  ;;  %s383_s24 = sshra.s32 %s2669_s19, 3  ;;  %s386_s25 = sand.u32 7, %s2669_s19 }
 0x14d   :  { %3465 = vrcp.f32 %v697_v44  ;;  %v3462_v49 = vpop.eup %3461  ;;  %s2744_s27 = sshll.u32 %s383_s24, 5  ;;  %s395_s11 = sand.u32 7, %s2670_s22 }
 0x14e   :  { %3467 = vrcp.f32 %v698_v47  ;;  %v3464_v50 = vpop.eup %3463  ;;  %v707_v57 = vadd.f32 1.0, %v3462_v49  ;;  %s389_s30 = sadd.s32 %s2744_s27, %s386_s25  ;;  %s2681_s19 = sld [smem:[#allocation4 + $0x7]] }
 0x14f   :  { %s390_s12 = scalar_lea.vmem [#allocation8], %s389_s30 }
 0x150   :  { %3469 = vrcp.f32 %v707_v57 }
 0x154   :  { %s431_s24 = sshra.s32 %s2681_s19, 3  ;;  %s434_s25 = sand.u32 7, %s2681_s19 }
 0x155   :  { %s2748_s27 = sshll.u32 %s431_s24, 5 }
 0x156   :  { %s437_s30 = sadd.s32 %s2748_s27, %s434_s25 }
 0x157   :  { %v3466_v56 = vpop.eup %3465 }
 0x158   :  { %v3468_v60 = vpop.eup %3467  ;;  %v711_v61 = vmul.f32 %v3466_v56, %v3464_v50  ;;  %v719_v50 = vld [vmem:[#allocation2 + $0x18] sm:$0xc] }
 0x159   :  { %v710_v0 = vmul.f32 0.0, %v3468_v60  ;;  %v718_v60 = vld [vmem:[#allocation2 + $0x10] sm:$0xc] }
 0x15a   :  { %v3470_v4 = vpop.eup %3469 }
 0x15b   :  { %v4030_v2 = vadd.f32 %v711_v61, %v710_v0 }
 0x15d   :  { %3471 = vtanh.f32 %v4030_v2  ;;  %v898_v20 = vrot.slane %v4030_v2, 6  ;;  %v247_v2 = vld [vmem:[%s246_s23] ss:$8 sm:$0xf]  ;;  %s375_s23 = scalar_lea.vmem [#allocation9], %s4077_s29  ;;  %s2675_s29 = sld [smem:[#allocation4 + $0x86]] }
 0x163   :  { %s410_s14 = sand.u32 7, %s2675_s29 }
 0x167   :  { %v3472_v5 = vpop.eup %3471 }
 0x168   :  { %v4033_v6 = vmul.f32 %v3472_v5, %v3470_v4 }
 0x16a   :  { %785 = vmatmul.mubr.f32.vlgmr.msra.gmra.mrb[2].mxu0 %v4033_v6  ;;  %856 = vmatmul.mubr.f32.vlgmr.msra.gmra.mrb[2].mxu1 %v4033_v6 }
 0x16b   :  { %3004 = vmatpush1.bf16.msra.mxu0 %v3857_v8  ;;  %3036 = vmatpush1.bf16.msra.mxu1 %v3874_v25 }
 0x16c   :  { %3006 = vmatprep.subr.bf16.mxu0 %v3859_v9  ;;  %3038 = vmatprep.subr.bf16.mxu1 %v3885_v33 }
 0x16d   :  { %977 = vmatprep.mubr.f32.mxu0 %v3735_v7  ;;  %1048 = vmatprep.mubr.f32.mxu1 %v3735_v7 }
 0x16f   :  { %3008 = vmatpush1.bf16.msra.mxu0 %v3865_v14  ;;  %3040 = vmatpush1.bf16.msra.mxu1 %v3888_v37 }
 0x170   :  { %3010 = vmatprep.subr.bf16.mxu0 %v3870_v17  ;;  %3042 = vmatprep.subr.bf16.mxu1 %v3897_v45 }
 0x173   :  { %3012 = vmatpush1.bf16.msra.mxu0 %v3877_v26  ;;  %3044 = vmatpush1.bf16.msra.mxu1 %v3904_v48 }
 0x174   :  { %3014 = vmatprep.subr.bf16.mxu0 %v3882_v30  ;;  %3046 = vmatprep.subr.bf16.mxu1 %v3908_v52 }
 0x177   :  { %3016 = vmatpush1.bf16.msra.mxu0 %v3895_v42  ;;  %3048 = vmatpush1.bf16.msra.mxu1 %v3928_v62 }
 0x178   :  { %3018 = vmatprep.subr.bf16.mxu0 %v3901_v46  ;;  %3050 = vmatprep.subr.bf16.mxu1 %v3933_v1 }
 0x17b   :  { %3020 = vmatpush1.bf16.msra.mxu0 %v3916_v55  ;;  %3052 = vmatpush1.bf16.msra.mxu1 %v3942_v18 }
 0x17c   :  { %3022 = vmatprep.subr.bf16.mxu0 %v3925_v58  ;;  %3054 = vmatprep.subr.bf16.mxu1 %v3951_v24 }
 0x17f   :  { %3024 = vmatpush1.bf16.msra.mxu0 %v3936_v11  ;;  %3056 = vmatpush1.bf16.msra.mxu1 %v3963_v41 }
 0x180   :  { %3026 = vmatprep.subr.bf16.mxu0 %v3939_v16  ;;  %3058 = vmatprep.subr.bf16.mxu1 %v3968_v43 }
 0x183   :  { %3028 = vmatpush1.bf16.msra.mxu0 %v3957_v35  ;;  %3060 = vmatpush1.bf16.msra.mxu1 %v3977_v53 }
 0x184   :  { %3030 = vmatprep.subr.bf16.mxu0 %v3960_v38  ;;  %3062 = vmatprep.subr.bf16.mxu1 %v3980_v54 }
 0x187   :  { %3032 = vmatpush1.bf16.msra.mxu0 %v3973_v51  ;;  %3064 = vmatpush1.bf16.msra.mxu1 %v3984_v59 }
 0x188   :  { %3066 = vmatprep.subr.bf16.mxu0 %v3851_v3  ;;  %3098 = vmatprep.subr.bf16.mxu1 %v3872_v22 }
 0x23d   :  { %v786_v27 = vpop.f32.mrb[2].mxu0  ;;  %v857_v28 = vpop.f32.mrb[2].mxu1 }
 0x23e   :  { %v866_v29 = vrot.slane %v786_v27, 6  ;;  %v788_v32 = vpop.f32.mrb[3].mxu0  ;;  %v859_v34 = vpop.f32.mrb[3].mxu1  ;;  %v868_v57 = vrot.slane %v857_v28, 6 }
 0x23f   :  { %v867_v36 = vrot.slane %v788_v32, 6  ;;  %v869_v49 = vrot.slane %v859_v34, 6 }
 0x240   :  { %v874_v39 = vadd.f32 %v866_v29, %v716_v21  ;;  %v876_v0 = vadd.f32 %v868_v57, %v718_v60 }
 0x241   :  { %v875_v40 = vadd.f32 %v867_v36, %v717_v31  ;;  %v877_v56 = vadd.f32 %v869_v49, %v719_v50  ;;  %v280_v49 = vld [vmem:[%s279_s18] ss:$8 sm:$0xf] }
 0x242   :  { %v2695_v44 = vmul.f32 -1.442695, %v874_v39 }
 0x243   :  { %v2696_v47 = vmul.f32 -1.442695, %v875_v40  ;;  %v2697_v61 = vmul.f32 -1.442695, %v877_v56  ;;  %v906_v56 = vld [vmem:[#allocation2] sm:$0x30] }
 0x244   :  { %3473 = vpow2.f32 %v2695_v44  ;;  %v256_v40 = vld [vmem:[%s255_s28] ss:$8 sm:$0xf]  ;;  %s392_s28 = sshra.s32 %s2670_s22, 3  ;;  %s430_s22 = sld [smem:[#allocation4]] }
 0x245   :  { %3475 = vpow2.f32 %v2696_v47  ;;  %v257_v44 = vadd.f32 %v256_v40, %v247_v2  ;;  %v271_v47 = vld [vmem:[%s270_s3] ss:$8 sm:$0xf]  ;;  %s2745_s13 = sshll.u32 %s392_s28, 5  ;;  %s407_s3 = sshra.s32 %s2675_s29, 3 }
 0x246   :  { %3477 = vpow2.f32 %v2697_v61  ;;  %v281_v50 = vadd.f32 %v280_v49, %v271_v47  ;;  %s398_s16 = sadd.s32 %s2745_s13, %s395_s11  ;;  %s2686_s29 = sld [smem:[#allocation4 + $0x87]] }
 0x247   :  { %3479 = vtanh.f32 %v876_v0  ;;  %259 = vst.msk [vmem:[#allocation2 + $0x6] ss:$8 sm:$0xf] %vm3946_vm0, %v257_v44  ;;  %v907_v0 = vld [vmem:[#allocation2 + $0x8] sm:$0x30]  ;;  %s399_s18 = scalar_lea.vmem [#allocation9], %s398_s16 }
 0x248   :  { %283 = vst.msk [vmem:[#allocation2 + $0x7] ss:$8 sm:$0xf] %vm3946_vm0, %v281_v50 }
 0x24a   :  { %s440_s28 = sshra.s32 %s430_s22, 3  ;;  %s443_s11 = sand.u32 7, %s430_s22 }
 0x24b   :  { %s2749_s13 = sshll.u32 %s440_s28, 5 }
 0x24c   :  { %s446_s16 = sadd.s32 %s2749_s13, %s443_s11 }
 0x24e   :  { %v3474_v4 = vpop.eup %3473 }
 0x24f   :  { %v3476_v5 = vpop.eup %3475  ;;  %v884_v10 = vadd.f32 1.0, %v3474_v4 }
 0x250   :  { %v885_v12 = vadd.f32 1.0, %v3476_v5  ;;  %v3478_v13 = vpop.eup %3477 }
 0x251   :  { %3481 = vrcp.f32 %v884_v10  ;;  %v3480_v15 = vpop.eup %3479  ;;  %v894_v29 = vadd.f32 1.0, %v3478_v13 }
 0x252   :  { %3483 = vrcp.f32 %v885_v12 }
 0x253   :  { %3485 = vrcp.f32 %v894_v29 }
 0x25b   :  { %v3482_v19 = vpop.eup %3481 }
 0x25c   :  { %v3484_v21 = vpop.eup %3483  ;;  %v901_v27 = vmul.f32 %v3482_v19, %v3480_v15 }
 0x25d   :  { %v900_v28 = vmul.f32 %v3484_v21, %v898_v20  ;;  %v3486_v32 = vpop.eup %3485  ;;  %v909_v21 = vld [vmem:[#allocation2 + $0x18] sm:$0x30] }
 0x25f   :  { %v4088_v31 = vadd.f32 %v901_v27, %v900_v28  ;;  %v908_v28 = vld [vmem:[#allocation2 + $0x10] sm:$0x30] }
 0x261   :  { %3487 = vtanh.f32 %v4088_v31 }
 0x26b   :  { %v3488_v34 = vpop.eup %3487 }
 0x26c   :  { %v4091_v36 = vmul.f32 %v3488_v34, %v3486_v32 }
 0x26e   :  { %v911_v39 = vrot.slane %v4091_v36, 2 }
 0x270   :  { %978 = vmatmul.mubr.f32.vlgmr.msra.gmra.mrb[4].mxu0 %v911_v39  ;;  %1049 = vmatmul.mubr.f32.vlgmr.msra.gmra.mrb[4].mxu1 %v911_v39 }
 0x271   :  { %3068 = vmatpush1.bf16.msra.mxu0 %v3857_v8  ;;  %3100 = vmatpush1.bf16.msra.mxu1 %v3874_v25 }
 0x272   :  { %3070 = vmatprep.subr.bf16.mxu0 %v3859_v9  ;;  %3102 = vmatprep.subr.bf16.mxu1 %v3885_v33 }
 0x273   :  { %1170 = vmatprep.mubr.f32.mxu0 %v3735_v7  ;;  %1241 = vmatprep.mubr.f32.mxu1 %v3735_v7 }
 0x275   :  { %3072 = vmatpush1.bf16.msra.mxu0 %v3865_v14  ;;  %3104 = vmatpush1.bf16.msra.mxu1 %v3888_v37 }
 0x276   :  { %3074 = vmatprep.subr.bf16.mxu0 %v3870_v17  ;;  %3106 = vmatprep.subr.bf16.mxu1 %v3897_v45 }
 0x279   :  { %3076 = vmatpush1.bf16.msra.mxu0 %v3877_v26  ;;  %3108 = vmatpush1.bf16.msra.mxu1 %v3904_v48 }
 0x27a   :  { %3078 = vmatprep.subr.bf16.mxu0 %v3882_v30  ;;  %3110 = vmatprep.subr.bf16.mxu1 %v3908_v52 }
 0x27d   :  { %3080 = vmatpush1.bf16.msra.mxu0 %v3895_v42  ;;  %3112 = vmatpush1.bf16.msra.mxu1 %v3928_v62 }
 0x27e   :  { %3082 = vmatprep.subr.bf16.mxu0 %v3901_v46  ;;  %3114 = vmatprep.subr.bf16.mxu1 %v3933_v1 }
 0x281   :  { %3084 = vmatpush1.bf16.msra.mxu0 %v3916_v55  ;;  %3116 = vmatpush1.bf16.msra.mxu1 %v3942_v18 }
 0x282   :  { %3086 = vmatprep.subr.bf16.mxu0 %v3925_v58  ;;  %3118 = vmatprep.subr.bf16.mxu1 %v3951_v24 }
 0x285   :  { %3088 = vmatpush1.bf16.msra.mxu0 %v3936_v11  ;;  %3120 = vmatpush1.bf16.msra.mxu1 %v3963_v41 }
 0x286   :  { %3090 = vmatprep.subr.bf16.mxu0 %v3939_v16  ;;  %3122 = vmatprep.subr.bf16.mxu1 %v3968_v43 }
 0x289   :  { %3092 = vmatpush1.bf16.msra.mxu0 %v3957_v35  ;;  %3124 = vmatpush1.bf16.msra.mxu1 %v3977_v53 }
 0x28a   :  { %3094 = vmatprep.subr.bf16.mxu0 %v3960_v38  ;;  %3126 = vmatprep.subr.bf16.mxu1 %v3980_v54 }
 0x28d   :  { %3096 = vmatpush1.bf16.msra.mxu0 %v3973_v51  ;;  %3128 = vmatpush1.bf16.msra.mxu1 %v3984_v59 }
 0x28e   :  { %3130 = vmatprep.subr.bf16.mxu0 %v3851_v3  ;;  %3162 = vmatprep.subr.bf16.mxu1 %v3872_v22 }
 0x343   :  { %v979_v57 = vpop.f32.mrb[4].mxu0  ;;  %v1050_v60 = vpop.f32.mrb[4].mxu1 }
 0x344   :  { %v1059_v61 = vrot.slane %v979_v57, 4  ;;  %v981_v4 = vpop.f32.mrb[5].mxu0  ;;  %v1052_v5 = vpop.f32.mrb[5].mxu1  ;;  %v1061_v29 = vrot.slane %v1050_v60, 4 }
 0x345   :  { %v1060_v10 = vrot.slane %v981_v4, 4  ;;  %v1062_v20 = vrot.slane %v1052_v5, 4 }
 0x346   :  { %v1067_v12 = vadd.f32 %v1059_v61, %v906_v56  ;;  %v1069_v34 = vadd.f32 %v1061_v29, %v908_v28  ;;  %v1091_v56 = vrot.slane %v4088_v31, 6  ;;  %v295_v31 = vld [vmem:[%s294_s0] ss:$8 sm:$0xf]  ;;  %v1099_v29 = vld [vmem:[#allocation2] sm:$0xc0] }
 0x347   :  { %v1068_v13 = vadd.f32 %v1060_v10, %v907_v0  ;;  %v1070_v27 = vadd.f32 %v1062_v20, %v909_v21  ;;  %v319_v20 = vld [vmem:[%s318_s2] ss:$8 sm:$0xf]  ;;  %s2746_s0 = sshll.u32 %s407_s3, 5  ;;  %s455_s3 = sshra.s32 %s2686_s29, 3 }
 0x348   :  { %v2698_v15 = vmul.f32 -1.442695, %v1067_v12  ;;  %v328_v21 = vld [vmem:[%s327_s17] ss:$8 sm:$0xf]  ;;  %s413_s2 = sadd.s32 %s2746_s0, %s410_s14  ;;  %s419_s17 = sand.u32 7, %s2676_s1 }
 0x349   :  { %v2699_v19 = vmul.f32 -1.442695, %v1068_v13  ;;  %v2700_v32 = vmul.f32 -1.442695, %v1070_v27  ;;  %v329_v27 = vadd.f32 %v328_v21, %v319_v20  ;;  %s458_s14 = sand.u32 7, %s2686_s29  ;;  %s2750_s0 = sshll.u32 %s455_s3, 5 }
 0x34a   :  { %3489 = vpow2.f32 %v2698_v15  ;;  %v304_v15 = vld [vmem:[%s303_s26] ss:$8 sm:$0xf]  ;;  %s416_s26 = sshra.s32 %s2676_s1, 3  ;;  %s2687_s1 = sld [smem:[#allocation4 + $0x80]] }
 0x34b   :  { %3491 = vpow2.f32 %v2699_v19  ;;  %v305_v19 = vadd.f32 %v304_v15, %v295_v31  ;;  %331 = vst.msk [vmem:[#allocation2 + $0x21] ss:$8 sm:$0xf] %vm3946_vm0, %v329_v27  ;;  %s3738_s29 = smov [#allocation12]  }
 0x34c   :  { %3493 = vpow2.f32 %v2700_v32 }
 0x34d   :  { %3495 = vtanh.f32 %v1069_v34  ;;  %307 = vst.msk [vmem:[#allocation2 + $0x20] ss:$8 sm:$0xf] %vm3946_vm0, %v305_v19 }
 0x354   :  { %v3490_v39 = vpop.eup %3489 }
 0x355   :  { %v3492_v2 = vpop.eup %3491  ;;  %v1077_v40 = vadd.f32 1.0, %v3490_v39  ;;  %v1100_v39 = vld [vmem:[#allocation2 + $0x8] sm:$0xc0] }
 0x356   :  { %v1078_v44 = vadd.f32 1.0, %v3492_v2  ;;  %v3494_v47 = vpop.eup %3493 }
 0x357   :  { %3497 = vrcp.f32 %v1077_v40  ;;  %v3496_v49 = vpop.eup %3495  ;;  %v1087_v0 = vadd.f32 1.0, %v3494_v47 }
 0x358   :  { %3499 = vrcp.f32 %v1078_v44 }
 0x359   :  { %3501 = vrcp.f32 %v1087_v0 }
 0x361   :  { %v3498_v50 = vpop.eup %3497 }
 0x362   :  { %v3500_v57 = vpop.eup %3499  ;;  %v1094_v61 = vmul.f32 %v3498_v50, %v3496_v49 }
 0x363   :  { %v1093_v60 = vmul.f32 %v3500_v57, %v1091_v56  ;;  %v3502_v5 = vpop.eup %3501 }
 0x365   :  { %v4145_v4 = vadd.f32 %v1094_v61, %v1093_v60  ;;  %v1102_v61 = vld [vmem:[#allocation2 + $0x18] sm:$0xc0] }
 0x367   :  { %3503 = vtanh.f32 %v4145_v4 }
 0x371   :  { %v3504_v10 = vpop.eup %3503 }
 0x372   :  { %v4148_v12 = vmul.f32 %v3504_v10, %v3502_v5  ;;  %v1101_v5 = vld [vmem:[#allocation2 + $0x10] sm:$0xc0] }
 0x374   :  { %v1104_v13 = vrot.slane %v4148_v12, 4 }
 0x376   :  { %1171 = vmatmul.mubr.f32.vlgmr.msra.gmra.mrb[6].mxu0 %v1104_v13  ;;  %1242 = vmatmul.mubr.f32.vlgmr.msra.gmra.mrb[6].mxu1 %v1104_v13 }
 0x377   :  { %3132 = vmatpush1.bf16.msra.mxu0 %v3857_v8  ;;  %3164 = vmatpush1.bf16.msra.mxu1 %v3874_v25 }
 0x378   :  { %3134 = vmatprep.subr.bf16.mxu0 %v3859_v9  ;;  %3166 = vmatprep.subr.bf16.mxu1 %v3885_v33 }
 0x379   :  { %1363 = vmatprep.mubr.f32.mxu0 %v3735_v7  ;;  %1434 = vmatprep.mubr.f32.mxu1 %v3735_v7 }
 0x37b   :  { %3136 = vmatpush1.bf16.msra.mxu0 %v3865_v14  ;;  %3168 = vmatpush1.bf16.msra.mxu1 %v3888_v37 }
 0x37c   :  { %3138 = vmatprep.subr.bf16.mxu0 %v3870_v17  ;;  %3170 = vmatprep.subr.bf16.mxu1 %v3897_v45 }
 0x37f   :  { %3140 = vmatpush1.bf16.msra.mxu0 %v3877_v26  ;;  %3172 = vmatpush1.bf16.msra.mxu1 %v3904_v48 }
 0x380   :  { %3142 = vmatprep.subr.bf16.mxu0 %v3882_v30  ;;  %3174 = vmatprep.subr.bf16.mxu1 %v3908_v52 }
 0x383   :  { %3144 = vmatpush1.bf16.msra.mxu0 %v3895_v42  ;;  %3176 = vmatpush1.bf16.msra.mxu1 %v3928_v62 }
 0x384   :  { %3146 = vmatprep.subr.bf16.mxu0 %v3901_v46  ;;  %3178 = vmatprep.subr.bf16.mxu1 %v3933_v1 }
 0x387   :  { %3148 = vmatpush1.bf16.msra.mxu0 %v3916_v55  ;;  %3180 = vmatpush1.bf16.msra.mxu1 %v3942_v18 }
 0x388   :  { %3150 = vmatprep.subr.bf16.mxu0 %v3925_v58  ;;  %3182 = vmatprep.subr.bf16.mxu1 %v3951_v24 }
 0x38b   :  { %3152 = vmatpush1.bf16.msra.mxu0 %v3936_v11  ;;  %3184 = vmatpush1.bf16.msra.mxu1 %v3963_v41 }
 0x38c   :  { %3154 = vmatprep.subr.bf16.mxu0 %v3939_v16  ;;  %3186 = vmatprep.subr.bf16.mxu1 %v3968_v43 }
 0x38f   :  { %3156 = vmatpush1.bf16.msra.mxu0 %v3957_v35  ;;  %3188 = vmatpush1.bf16.msra.mxu1 %v3977_v53 }
 0x390   :  { %3158 = vmatprep.subr.bf16.mxu0 %v3960_v38  ;;  %3190 = vmatprep.subr.bf16.mxu1 %v3980_v54 }
 0x393   :  { %3160 = vmatpush1.bf16.msra.mxu0 %v3973_v51  ;;  %3192 = vmatpush1.bf16.msra.mxu1 %v3984_v59 }
 0x394   :  { %3194 = vmatprep.subr.bf16.mxu0 %v3851_v3  ;;  %3226 = vmatprep.subr.bf16.mxu1 %v3872_v22 }
 0x449   :  { %v1172_v28 = vpop.f32.mrb[6].mxu0  ;;  %v1243_v32 = vpop.f32.mrb[6].mxu1 }
 0x44a   :  { %v1252_v34 = vrot.slane %v1172_v28, 2  ;;  %v1174_v2 = vpop.f32.mrb[7].mxu0  ;;  %v1245_v40 = vpop.f32.mrb[7].mxu1  ;;  %v1254_v60 = vrot.slane %v1243_v32, 2  ;;  %v1284_v28 = vrot.slane %v4145_v4, 6 }
 0x44b   :  { %v1253_v44 = vrot.slane %v1174_v2, 2  ;;  %v1255_v57 = vrot.slane %v1245_v40, 2  ;;  %v343_v4 = vld [vmem:[%s342_s20] ss:$8 sm:$0xf]  ;;  %s2747_s20 = sshll.u32 %s416_s26, 5 }
 0x44c   :  { %v1260_v47 = vadd.f32 %v1252_v34, %v1099_v29  ;;  %v1262_v13 = vadd.f32 %v1254_v60, %v1101_v5  ;;  %v1292_v5 = vld [vmem:[#allocation2 + $0x20] sm:$0x3]  ;;  %s464_s26 = sshra.s32 %s2687_s1, 3 }
 0x44d   :  { %v1261_v49 = vadd.f32 %v1253_v44, %v1100_v39  ;;  %v1263_v0 = vadd.f32 %v1255_v57, %v1102_v61  ;;  %v367_v61 = vld [vmem:[%s366_s15] ss:$8 sm:$0xf]  ;;  %s422_s15 = sadd.s32 %s2747_s20, %s419_s17  ;;  %s467_s17 = sand.u32 7, %s2687_s1 }
 0x44e   :  { %v2701_v50 = vmul.f32 -1.442695, %v1260_v47  ;;  %s2751_s20 = sshll.u32 %s464_s26, 5  ;;  %s2491_s1 = sshll.u32 %s3738_s29, 4  ;;  %s2492_s1 = int_to_ptr.vmem [resolvable:$true] %s2491_s1 }
 0x44f   :  { %v2702_v56 = vmul.f32 -1.442695, %v1261_v49  ;;  %v2703_v10 = vmul.f32 -1.442695, %v1263_v0  ;;  %p3704_p2 = scmp.lt.s32.totalorder %s2492_s1, %s2492_s1 }
 0x450   :  { %3505 = vpow2.f32 %v2701_v50  ;;  %v376_v0 = vld [vmem:[%s375_s23] ss:$8 sm:$0xf]  ;;  %s423_s23 = scalar_lea.vmem [#allocation9], %s422_s15  ;;  %s470_s15 = sadd.s32 %s2751_s20, %s467_s17 }
 0x451   :  { %3507 = vpow2.f32 %v2702_v56  ;;  %v352_v56 = vld [vmem:[%s351_s21] ss:$8 sm:$0xf]  ;;  %v377_v60 = vadd.f32 %v376_v0, %v367_v61  ;;  %s414_s21 = scalar_lea.vmem [#allocation8], %s413_s2  ;;  %s461_s2 = sadd.s32 %s2750_s0, %s458_s14 }
 0x452   :  { %3509 = vpow2.f32 %v2703_v10  ;;  %v353_v57 = vadd.f32 %v352_v56, %v343_v4  ;;  %v1293_v10 = vld [vmem:[#allocation2 + $0x28] sm:$0x3] }
 0x453   :  { %3511 = vtanh.f32 %v1262_v13  ;;  %379 = vst.msk [vmem:[#allocation2 + $0x23] ss:$8 sm:$0xf] %vm3946_vm0, %v377_v60 }
 0x454   :  { %355 = vst.msk [vmem:[#allocation2 + $0x22] ss:$8 sm:$0xf] %vm3946_vm0, %v353_v57 }
 0x45a   :  { %v3506_v31 = vpop.eup %3505 }
 0x45b   :  { %v3508_v15 = vpop.eup %3507  ;;  %v1270_v19 = vadd.f32 1.0, %v3506_v31 }
 0x45c   :  { %v1271_v20 = vadd.f32 1.0, %v3508_v15  ;;  %v3510_v21 = vpop.eup %3509 }
 0x45d   :  { %3513 = vrcp.f32 %v1270_v19  ;;  %v3512_v27 = vpop.eup %3511  ;;  %v1280_v2 = vadd.f32 1.0, %v3510_v21 }
 0x45e   :  { %3515 = vrcp.f32 %v1271_v20 }
 0x45f   :  { %3517 = vrcp.f32 %v1280_v2 }
 0x467   :  { %v3514_v29 = vpop.eup %3513 }
 0x468   :  { %v3516_v34 = vpop.eup %3515  ;;  %v1287_v39 = vmul.f32 %v3514_v29, %v3512_v27 }
 0x469   :  { %v1286_v32 = vmul.f32 %v3516_v34, %v1284_v28  ;;  %v3518_v44 = vpop.eup %3517  ;;  %v1295_v28 = vld [vmem:[#allocation2 + $0x38] sm:$0x3] }
 0x46b   :  { %v4194_v40 = vadd.f32 %v1287_v39, %v1286_v32  ;;  %v1294_v39 = vld [vmem:[#allocation2 + $0x30] sm:$0x3] }
 0x46d   :  { %3519 = vtanh.f32 %v4194_v40  ;;  %v1465_v0 = vrot.slane %v4194_v40, 6  ;;  %v4254_v40 = vand.u32 127, %v111_v63 }
 0x46f   :  { %vm2051_vm1 = vcmp.lt.s32.totalorder %v4254_v40, 32  ;;  %v2307_v40 = vld [vmem:[%s4522_s6 + $0x10] sm:$0xff] }
 0x477   :  { %v3520_v47 = vpop.eup %3519 }
 0x478   :  { %v4197_v49 = vmul.f32 %v3520_v47, %v3518_v44 }
 0x47a   :  { %v1297_v50 = vrot.slane %v4197_v49, 6 }
 0x47c   :  { %1364 = vmatmul.mubr.f32.vlgmr.msra.gmra.mrb[8].mxu0 %v1297_v50  ;;  %1435 = vmatmul.mubr.f32.vlgmr.msra.gmra.mrb[8].mxu1 %v1297_v50 }
 0x47d   :  { %3196 = vmatpush1.bf16.msra.mxu0 %v3857_v8  ;;  %3228 = vmatpush1.bf16.msra.mxu1 %v3874_v25 }
 0x47e   :  { %3198 = vmatprep.subr.bf16.mxu0 %v3859_v9  ;;  %3230 = vmatprep.subr.bf16.mxu1 %v3885_v33 }
 0x47f   :  { %1541 = vmatprep.mubr.f32.mxu0 %v3735_v7  ;;  %1612 = vmatprep.mubr.f32.mxu1 %v3735_v7 }
 0x481   :  { %3200 = vmatpush1.bf16.msra.mxu0 %v3865_v14  ;;  %3232 = vmatpush1.bf16.msra.mxu1 %v3888_v37 }
 0x482   :  { %3202 = vmatprep.subr.bf16.mxu0 %v3870_v17  ;;  %3234 = vmatprep.subr.bf16.mxu1 %v3897_v45 }
 0x485   :  { %3204 = vmatpush1.bf16.msra.mxu0 %v3877_v26  ;;  %3236 = vmatpush1.bf16.msra.mxu1 %v3904_v48 }
 0x486   :  { %3206 = vmatprep.subr.bf16.mxu0 %v3882_v30  ;;  %3238 = vmatprep.subr.bf16.mxu1 %v3908_v52 }
 0x489   :  { %3208 = vmatpush1.bf16.msra.mxu0 %v3895_v42  ;;  %3240 = vmatpush1.bf16.msra.mxu1 %v3928_v62 }
 0x48a   :  { %3210 = vmatprep.subr.bf16.mxu0 %v3901_v46  ;;  %3242 = vmatprep.subr.bf16.mxu1 %v3933_v1 }
 0x48d   :  { %3212 = vmatpush1.bf16.msra.mxu0 %v3916_v55  ;;  %3244 = vmatpush1.bf16.msra.mxu1 %v3942_v18 }
 0x48e   :  { %3214 = vmatprep.subr.bf16.mxu0 %v3925_v58  ;;  %3246 = vmatprep.subr.bf16.mxu1 %v3951_v24 }
 0x491   :  { %3216 = vmatpush1.bf16.msra.mxu0 %v3936_v11  ;;  %3248 = vmatpush1.bf16.msra.mxu1 %v3963_v41 }
 0x492   :  { %3218 = vmatprep.subr.bf16.mxu0 %v3939_v16  ;;  %3250 = vmatprep.subr.bf16.mxu1 %v3968_v43 }
 0x495   :  { %3220 = vmatpush1.bf16.msra.mxu0 %v3957_v35  ;;  %3252 = vmatpush1.bf16.msra.mxu1 %v3977_v53 }
 0x496   :  { %3222 = vmatprep.subr.bf16.mxu0 %v3960_v38  ;;  %3254 = vmatprep.subr.bf16.mxu1 %v3980_v54 }
 0x499   :  { %3224 = vmatpush1.bf16.msra.mxu0 %v3973_v51  ;;  %3256 = vmatpush1.bf16.msra.mxu1 %v3984_v59 }
 0x49a   :  { %3258 = vmatprep.subr.bf16.mxu0 %v3851_v3  ;;  %3290 = vmatprep.subr.bf16.mxu1 %v3872_v22 }
 0x54f   :  { %v1365_v13 = vpop.f32.mrb[8].mxu0  ;;  %v1436_v31 = vpop.f32.mrb[8].mxu1 }
 0x550   :  { %v1441_v15 = vadd.f32 %v1365_v13, %v1292_v5  ;;  %v1367_v19 = vpop.f32.mrb[9].mxu0  ;;  %v1438_v20 = vpop.f32.mrb[9].mxu1  ;;  %v1443_v32 = vadd.f32 %v1436_v31, %v1294_v39  ;;  %v415_v39 = vld [vmem:[%s414_s21] ss:$8 sm:$0xf]  ;;  %s462_s21 = scalar_lea.vmem [#allocation8], %s461_s2 }
 0x551   :  { %v1442_v21 = vadd.f32 %v1367_v19, %v1293_v10  ;;  %v1444_v34 = vadd.f32 %v1438_v20, %v1295_v28 }
 0x552   :  { %v2704_v27 = vmul.f32 -1.442695, %v1441_v15 }
 0x553   :  { %v2705_v29 = vmul.f32 -1.442695, %v1442_v21  ;;  %v2706_v2 = vmul.f32 -1.442695, %v1444_v34 }
 0x554   :  { %3521 = vpow2.f32 %v2704_v27  ;;  %v391_v34 = vld [vmem:[%s390_s12] ss:$8 sm:$0xf]  ;;  %s438_s12 = scalar_lea.vmem [#allocation8], %s437_s30 }
 0x555   :  { %3523 = vpow2.f32 %v2705_v29 }
 0x556   :  { %3525 = vpow2.f32 %v2706_v2  ;;  %v424_v2 = vld [vmem:[%s423_s23] ss:$8 sm:$0xf]  ;;  %s471_s23 = scalar_lea.vmem [#allocation9], %s470_s15 }
 0x557   :  { %3527 = vtanh.f32 %v1443_v32  ;;  %v425_v32 = vadd.f32 %v424_v2, %v415_v39 }
 0x559   :  { %427 = vst.msk [vmem:[#allocation2 + $0x25] ss:$8 sm:$0xf] %vm3946_vm0, %v425_v32 }
 0x55e   :  { %v3522_v44 = vpop.eup %3521 }
 0x55f   :  { %v3524_v47 = vpop.eup %3523  ;;  %v1451_v50 = vadd.f32 1.0, %v3522_v44  ;;  %v1473_v44 = vld [vmem:[#allocation2 + $0x20] sm:$0xc] }
 0x560   :  { %v1452_v4 = vadd.f32 1.0, %v3524_v47  ;;  %v3526_v56 = vpop.eup %3525 }
 0x561   :  { %3529 = vrcp.f32 %v1451_v50  ;;  %v3528_v57 = vpop.eup %3527  ;;  %v1461_v10 = vadd.f32 1.0, %v3526_v56  ;;  %v1474_v56 = vld [vmem:[#allocation2 + $0x28] sm:$0xc] }
 0x562   :  { %3531 = vrcp.f32 %v1452_v4 }
 0x563   :  { %3533 = vrcp.f32 %v1461_v10 }
 0x56b   :  { %v3530_v61 = vpop.eup %3529 }
 0x56c   :  { %v3532_v60 = vpop.eup %3531  ;;  %v1468_v5 = vmul.f32 %v3530_v61, %v3528_v57 }
 0x56d   :  { %v1467_v13 = vmul.f32 %v3532_v60, %v1465_v0  ;;  %v3534_v31 = vpop.eup %3533 }
 0x56f   :  { %v4243_v15 = vadd.f32 %v1468_v5, %v1467_v13 }
 0x571   :  { %3535 = vtanh.f32 %v4243_v15 }
 0x572   :  { %3537 = vtanh.f32 %v4197_v49 }
 0x57b   :  { %v3536_v19 = vpop.eup %3535 }
 0x57c   :  { %v1471_v20 = vmul.f32 %v3536_v19, %v3534_v31  ;;  %v3538_v49 = vpop.eup %3537  ;;  %v1476_v19 = vld [vmem:[#allocation2 + $0x38] sm:$0xc] }
 0x57d   :  { %v2073_v21 = vrot.slane %v3538_v49, 6 }
 0x57e   :  { %3539 = vtanh.f32 %v1471_v20  ;;  %1542 = vmatmul.mubr.f32.vlgmr.msra.gmra.mrb[10].mxu0 %v1471_v20  ;;  %1613 = vmatmul.mubr.f32.vlgmr.msra.gmra.mrb[10].mxu1 %v1471_v20 }
 0x57f   :  { %3260 = vmatpush1.bf16.msra.mxu0 %v3857_v8  ;;  %3292 = vmatpush1.bf16.msra.mxu1 %v3874_v25 }
 0x580   :  { %3262 = vmatprep.subr.bf16.mxu0 %v3859_v9  ;;  %3294 = vmatprep.subr.bf16.mxu1 %v3885_v33 }
 0x581   :  { %1734 = vmatprep.mubr.f32.mxu0 %v3735_v7  ;;  %1805 = vmatprep.mubr.f32.mxu1 %v3735_v7 }
 0x583   :  { %3264 = vmatpush1.bf16.msra.mxu0 %v3865_v14  ;;  %3296 = vmatpush1.bf16.msra.mxu1 %v3888_v37 }
 0x584   :  { %3266 = vmatprep.subr.bf16.mxu0 %v3870_v17  ;;  %3298 = vmatprep.subr.bf16.mxu1 %v3897_v45 }
 0x587   :  { %3268 = vmatpush1.bf16.msra.mxu0 %v3877_v26  ;;  %3300 = vmatpush1.bf16.msra.mxu1 %v3904_v48 }
 0x588   :  { %v3540_v27 = vpop.eup %3539  ;;  %3270 = vmatprep.subr.bf16.mxu0 %v3882_v30  ;;  %3302 = vmatprep.subr.bf16.mxu1 %v3908_v52 }
 0x589   :  { %v2068_v63 = vrot.slane %v3540_v27, 2  ;;  %v4267_v29 = vsel %vm2051_vm1, %v3540_v27, %v2073_v21  ;;  %v1475_v21 = vld [vmem:[#allocation2 + $0x30] sm:$0xc] }
 0x58a   :  { %2076 = vst [vmem:[#allocation3 + $0x8] sm:$0x3] %v4267_v29 }
 0x58b   :  { %v4272_v28 = vsel %vm2051_vm1, %v3538_v49, %v2068_v63  ;;  %3272 = vmatpush1.bf16.msra.mxu0 %v3895_v42  ;;  %3304 = vmatpush1.bf16.msra.mxu1 %v3928_v62 }
 0x58c   :  { %2071 = vst [vmem:[#allocation3] sm:$0xc0] %v4272_v28  ;;  %3274 = vmatprep.subr.bf16.mxu0 %v3901_v46  ;;  %3306 = vmatprep.subr.bf16.mxu1 %v3933_v1 }
 0x58f   :  { %3276 = vmatpush1.bf16.msra.mxu0 %v3916_v55  ;;  %3308 = vmatpush1.bf16.msra.mxu1 %v3942_v18 }
 0x590   :  { %3278 = vmatprep.subr.bf16.mxu0 %v3925_v58  ;;  %3310 = vmatprep.subr.bf16.mxu1 %v3951_v24 }
 0x593   :  { %3280 = vmatpush1.bf16.msra.mxu0 %v3936_v11  ;;  %3312 = vmatpush1.bf16.msra.mxu1 %v3963_v41 }
 0x594   :  { %3282 = vmatprep.subr.bf16.mxu0 %v3939_v16  ;;  %3314 = vmatprep.subr.bf16.mxu1 %v3968_v43 }
 0x597   :  { %3284 = vmatpush1.bf16.msra.mxu0 %v3957_v35  ;;  %3316 = vmatpush1.bf16.msra.mxu1 %v3977_v53 }
 0x598   :  { %3286 = vmatprep.subr.bf16.mxu0 %v3960_v38  ;;  %3318 = vmatprep.subr.bf16.mxu1 %v3980_v54 }
 0x59b   :  { %3288 = vmatpush1.bf16.msra.mxu0 %v3973_v51  ;;  %3320 = vmatpush1.bf16.msra.mxu1 %v3984_v59 }
 0x59c   :  { %3322 = vmatprep.subr.bf16.mxu0 %v3851_v3  ;;  %3354 = vmatprep.subr.bf16.mxu1 %v3872_v22  ;;  %v400_v3 = vld [vmem:[%s399_s18] ss:$8 sm:$0xf]  ;;  %s447_s18 = scalar_lea.vmem [#allocation9], %s446_s16 }
 0x59d   :  { %v401_v22 = vadd.f32 %v400_v3, %v391_v34 }
 0x59f   :  { %403 = vst.msk [vmem:[#allocation2 + $0x24] ss:$8 sm:$0xf] %vm3946_vm0, %v401_v22 }
 0x5a6   :  { %v1665_v23 = vld [vmem:[#allocation2 + $0x30] sm:$0x30] }
 0x651   :  { %v1543_v47 = vpop.f32.mrb[10].mxu0  ;;  %v1614_v50 = vpop.f32.mrb[10].mxu1 }
 0x652   :  { %v1623_v4 = vrot.slane %v1543_v47, 6  ;;  %v1545_v57 = vpop.f32.mrb[11].mxu0  ;;  %v1616_v61 = vpop.f32.mrb[11].mxu1  ;;  %v1625_v49 = vrot.slane %v1614_v50, 6  ;;  %v1655_v47 = vrot.slane %v4243_v15, 6 }
 0x653   :  { %v1624_v0 = vrot.slane %v1545_v57, 6  ;;  %v1626_v31 = vrot.slane %v1616_v61, 6 }
 0x654   :  { %v1631_v60 = vadd.f32 %v1623_v4, %v1473_v44  ;;  %v1633_v63 = vadd.f32 %v1625_v49, %v1475_v21 }
 0x655   :  { %v1632_v5 = vadd.f32 %v1624_v0, %v1474_v56  ;;  %v1634_v20 = vadd.f32 %v1626_v31, %v1476_v19 }
 0x656   :  { %v2707_v10 = vmul.f32 -1.442695, %v1631_v60 }
 0x657   :  { %v2708_v13 = vmul.f32 -1.442695, %v1632_v5  ;;  %v2709_v27 = vmul.f32 -1.442695, %v1634_v20 }
 0x658   :  { %3541 = vpow2.f32 %v2707_v10 }
 0x659   :  { %3543 = vpow2.f32 %v2708_v13 }
 0x65a   :  { %3545 = vpow2.f32 %v2709_v27 }
 0x65b   :  { %3547 = vtanh.f32 %v1633_v63 }
 0x662   :  { %v3542_v34 = vpop.eup %3541 }
 0x663   :  { %v3544_v3 = vpop.eup %3543  ;;  %v1641_v22 = vadd.f32 1.0, %v3542_v34 }
 0x664   :  { %v1642_v39 = vadd.f32 1.0, %v3544_v3  ;;  %v3546_v2 = vpop.eup %3545 }
 0x665   :  { %3549 = vrcp.f32 %v1641_v22  ;;  %v3548_v32 = vpop.eup %3547  ;;  %v1651_v57 = vadd.f32 1.0, %v3546_v2 }
 0x666   :  { %3551 = vrcp.f32 %v1642_v39 }
 0x667   :  { %3553 = vrcp.f32 %v1651_v57 }
 0x66f   :  { %v3550_v44 = vpop.eup %3549 }
 0x670   :  { %v3552_v4 = vpop.eup %3551  ;;  %v1658_v56 = vmul.f32 %v3550_v44, %v3548_v32 }
 0x671   :  { %v1657_v50 = vmul.f32 %v3552_v4, %v1655_v47  ;;  %v3554_v0 = vpop.eup %3553 }
 0x673   :  { %v4300_v61 = vadd.f32 %v1658_v56, %v1657_v50 }
 0x675   :  { %3555 = vtanh.f32 %v4300_v61  ;;  %v1848_v21 = vrot.slane %v4300_v61, 6 }
 0x676   :  { %3557 = vtanh.f32 %v4148_v12 }
 0x67f   :  { %v3556_v60 = vpop.eup %3555 }
 0x680   :  { %v1661_v5 = vmul.f32 %v3556_v60, %v3554_v0  ;;  %v3558_v15 = vpop.eup %3557  ;;  %v2095_v0 = vld [vmem:[%s4520_s4 + $0x8] sm:$0xff] }
 0x682   :  { %3559 = vtanh.f32 %v1661_v5  ;;  %v1668_v10 = vrot.slane %v1661_v5, 2  ;;  %v2096_v5 = vld [vmem:[%s4520_s4 + $0x10] sm:$0xff] }
 0x684   :  { %1735 = vmatmul.mubr.f32.vlgmr.msra.gmra.mrb[12].mxu0 %v1668_v10  ;;  %1806 = vmatmul.mubr.f32.vlgmr.msra.gmra.mrb[12].mxu1 %v1668_v10  ;;  %v2097_v10 = vld [vmem:[%s4520_s4 + $0x18] sm:$0xff] }
 0x685   :  { %3324 = vmatpush1.bf16.msra.mxu0 %v3857_v8  ;;  %3356 = vmatpush1.bf16.msra.mxu1 %v3874_v25  ;;  %v2078_v8 = vrot.slane %v3558_v15, 2 }
 0x686   :  { %3326 = vmatprep.subr.bf16.mxu0 %v3859_v9  ;;  %3358 = vmatprep.subr.bf16.mxu1 %v3885_v33  ;;  %v463_v33 = vld [vmem:[%s462_s21] ss:$8 sm:$0xf] }
 0x687   :  { %1927 = vmatprep.mubr.f32.mxu0 %v3735_v7  ;;  %1998 = vmatprep.mubr.f32.mxu1 %v3735_v7 }
 0x689   :  { %3328 = vmatpush1.bf16.msra.mxu0 %v3865_v14  ;;  %3360 = vmatpush1.bf16.msra.mxu1 %v3888_v37  ;;  %v472_v37 = vld [vmem:[%s471_s23] ss:$8 sm:$0xf] }
 0x68a   :  { %3330 = vmatprep.subr.bf16.mxu0 %v3870_v17  ;;  %3362 = vmatprep.subr.bf16.mxu1 %v3897_v45  ;;  %v439_v17 = vld [vmem:[%s438_s12] ss:$8 sm:$0xf]  ;;  %v1663_v45 = vld [vmem:[#allocation2 + $0x20] sm:$0x30] }
 0x68c   :  { %v3560_v12 = vpop.eup %3559 }
 0x68d   :  { %v2063_v25 = vrot.slane %v3560_v12, 6  ;;  %v4316_v9 = vsel %vm2051_vm1, %v3560_v12, %v2078_v8  ;;  %3332 = vmatpush1.bf16.msra.mxu0 %v3877_v26  ;;  %3364 = vmatpush1.bf16.msra.mxu1 %v3904_v48  ;;  %v448_v26 = vld [vmem:[%s447_s18] ss:$8 sm:$0xf] }
 0x68e   :  { %2081 = vst [vmem:[#allocation3 + $0x8] sm:$0xc] %v4316_v9  ;;  %3334 = vmatprep.subr.bf16.mxu0 %v3882_v30  ;;  %3366 = vmatprep.subr.bf16.mxu1 %v3908_v52  ;;  %v449_v30 = vadd.f32 %v448_v26, %v439_v17  ;;  %v2098_v8 = vld [vmem:[%s4520_s4 + $0x20] sm:$0xff]  ;;  %v2099_v12 = vld [vmem:[%s4520_s4 + $0x28] sm:$0xff]  ;;  %v2100_v17 = vld [vmem:[%s4520_s4 + $0x30] sm:$0xff] }
 0x68f   :  { %v4325_v14 = vsel %vm2051_vm1, %v3558_v15, %v2063_v25  ;;  %v3389_v15 = vpack.c.bf16 %v2097_v10, %v2096_v5  ;;  %v3393_v25 = vpack.c.bf16 %v2099_v12, %v2098_v8  ;;  %v2101_v26 = vld [vmem:[%s4520_s4 + $0x38] sm:$0xff] }
 0x690   :  { %2066 = vst [vmem:[#allocation3] sm:$0x30] %v4325_v14  ;;  %451 = vst.msk [vmem:[#allocation2 + $0x26] ss:$8 sm:$0xf] %vm3946_vm0, %v449_v30  ;;  %v3397_v30 = vpack.c.bf16 %v2101_v26, %v2100_v17 }
 0x691   :  { %3336 = vmatpush1.bf16.msra.mxu0 %v3895_v42  ;;  %3368 = vmatpush1.bf16.msra.mxu1 %v3928_v62  ;;  %v473_v42 = vadd.f32 %v472_v37, %v463_v33  ;;  %v2102_v33 = vld [vmem:[%s4520_s4 + $0x40] sm:$0xff]  ;;  %v2103_v37 = vld [vmem:[%s4520_s4 + $0x48] sm:$0xff] }
 0x692   :  { %3338 = vmatprep.subr.bf16.mxu0 %v3901_v46  ;;  %3370 = vmatprep.subr.bf16.mxu1 %v3933_v1 }
 0x693   :  { %475 = vst.msk [vmem:[#allocation2 + $0x27] ss:$8 sm:$0xf] %vm3946_vm0, %v473_v42  ;;  %v3401_v42 = vpack.c.bf16 %v2103_v37, %v2102_v33  ;;  %v2306_v33 = vld [vmem:[%s4522_s6 + $0x8] sm:$0xff] }
 0x695   :  { %3340 = vmatpush1.bf16.msra.mxu0 %v3916_v55  ;;  %3372 = vmatpush1.bf16.msra.mxu1 %v3942_v18  ;;  %v1664_v55 = vld [vmem:[#allocation2 + $0x28] sm:$0x30] }
 0x696   :  { %3342 = vmatprep.subr.bf16.mxu0 %v3925_v58  ;;  %3374 = vmatprep.subr.bf16.mxu1 %v3951_v24 }
 0x699   :  { %3344 = vmatpush1.bf16.msra.mxu0 %v3936_v11  ;;  %3376 = vmatpush1.bf16.msra.mxu1 %v3963_v41 }
 0x69a   :  { %3346 = vmatprep.subr.bf16.mxu0 %v3939_v16  ;;  %3378 = vmatprep.subr.bf16.mxu1 %v3968_v43 }
 0x69d   :  { %3348 = vmatpush1.bf16.msra.mxu0 %v3957_v35  ;;  %3380 = vmatpush1.bf16.msra.mxu1 %v3977_v53 }
 0x69e   :  { %3350 = vmatprep.subr.bf16.mxu0 %v3960_v38  ;;  %3382 = vmatprep.subr.bf16.mxu1 %v3980_v54  ;;  %v1666_v38 = vld [vmem:[#allocation2 + $0x38] sm:$0x30] }
 0x6a1   :  { %3352 = vmatpush1.bf16.msra.mxu0 %v3973_v51  ;;  %3384 = vmatpush1.bf16.msra.mxu1 %v3984_v59 }
 0x757   :  { %v1736_v46 = vpop.f32.mrb[12].mxu0  ;;  %v1807_v48 = vpop.f32.mrb[12].mxu1 }
 0x758   :  { %v1816_v52 = vrot.slane %v1736_v46, 4  ;;  %v1738_v58 = vpop.f32.mrb[13].mxu0  ;;  %v1809_v62 = vpop.f32.mrb[13].mxu1  ;;  %v1818_v43 = vrot.slane %v1807_v48, 4  ;;  %v2105_v46 = vld [vmem:[%s4520_s4 + $0x58] sm:$0xff] }
 0x759   :  { %v1817_v1 = vrot.slane %v1738_v58, 4  ;;  %v1819_v35 = vrot.slane %v1809_v62, 4  ;;  %v2108_v62 = vld [vmem:[%s4520_s4 + $0x70] sm:$0xff] }
 0x75a   :  { %v1824_v11 = vadd.f32 %v1816_v52, %v1663_v45  ;;  %v1826_v53 = vadd.f32 %v1818_v43, %v1665_v23  ;;  %v2104_v45 = vld [vmem:[%s4520_s4 + $0x50] sm:$0xff]  ;;  %v2106_v52 = vld [vmem:[%s4520_s4 + $0x60] sm:$0xff] }
 0x75b   :  { %v1825_v16 = vadd.f32 %v1817_v1, %v1664_v55  ;;  %v1827_v41 = vadd.f32 %v1819_v35, %v1666_v38  ;;  %v3405_v48 = vpack.c.bf16 %v2105_v46, %v2104_v45  ;;  %v2107_v55 = vld [vmem:[%s4520_s4 + $0x68] sm:$0xff]  ;;  %v2109_v1 = vld [vmem:[%s4520_s4 + $0x78] sm:$0xff] }
 0x75c   :  { %v2710_v18 = vmul.f32 -1.442695, %v1824_v11  ;;  %v3409_v58 = vpack.c.bf16 %v2107_v55, %v2106_v52  ;;  %v3413_v11 = vpack.c.bf16 %v2109_v1, %v2108_v62  ;;  %v1857_v38 = vld [vmem:[#allocation2 + $0x28] sm:$0xc0]  ;;  %v2308_v45 = vld [vmem:[%s4522_s6 + $0x18] sm:$0xff] }
 0x75d   :  { %v2711_v24 = vmul.f32 -1.442695, %v1825_v16  ;;  %v2712_v51 = vmul.f32 -1.442695, %v1827_v41  ;;  %v1856_v16 = vld [vmem:[#allocation2 + $0x20] sm:$0xc0]  ;;  %v3421_v46 = vpack.c.bf16 %v2308_v45, %v2307_v40 }
 0x75e   :  { %3561 = vpow2.f32 %v2710_v18  ;;  %v2310_v52 = vld [vmem:[%s4522_s6 + $0x28] sm:$0xff]  ;;  %v2312_v62 = vld [vmem:[%s4522_s6 + $0x38] sm:$0xff] }
 0x75f   :  { %3563 = vpow2.f32 %v2711_v24 }
 0x760   :  { %3565 = vpow2.f32 %v2712_v51 }
 0x761   :  { %3567 = vtanh.f32 %v1826_v53 }
 0x768   :  { %v3562_v54 = vpop.eup %3561 }
 0x769   :  { %v3564_v59 = vpop.eup %3563  ;;  %v1834_v13 = vadd.f32 1.0, %v3562_v54 }
 0x76a   :  { %v1835_v31 = vadd.f32 1.0, %v3564_v59  ;;  %v3566_v19 = vpop.eup %3565 }
 0x76b   :  { %3569 = vrcp.f32 %v1834_v13  ;;  %v3568_v20 = vpop.eup %3567  ;;  %v1844_v34 = vadd.f32 1.0, %v3566_v19 }
 0x76c   :  { %3571 = vrcp.f32 %v1835_v31  ;;  %v1859_v31 = vld [vmem:[#allocation2 + $0x38] sm:$0xc0] }
 0x76d   :  { %3573 = vrcp.f32 %v1844_v34 }
 0x775   :  { %v3570_v49 = vpop.eup %3569 }
 0x776   :  { %v3572_v27 = vpop.eup %3571  ;;  %v1851_v63 = vmul.f32 %v3570_v49, %v3568_v20  ;;  %v1858_v49 = vld [vmem:[#allocation2 + $0x30] sm:$0xc0] }
 0x777   :  { %v1850_v3 = vmul.f32 %v3572_v27, %v1848_v21  ;;  %v3574_v39 = vpop.eup %3573 }
 0x779   :  { %v4351_v22 = vadd.f32 %v1851_v63, %v1850_v3 }
 0x77b   :  { %3575 = vtanh.f32 %v4351_v22 }
 0x77c   :  { %3577 = vtanh.f32 %v4091_v36  ;;  %v2094_v36 = vld [vmem:[%s4520_s4] sm:$0xff] }
 0x77d   :  { %v3385_v60 = vpack.c.bf16 %v2095_v0, %v2094_v36 }
 0x77f   :  { %3386 = vmatprep.subr.bf16.mxu0 %v3385_v60 }
 0x785   :  { %v3576_v2 = vpop.eup %3575 }
 0x786   :  { %v1854_v32 = vmul.f32 %v3576_v2, %v3574_v39  ;;  %v3578_v47 = vpop.eup %3577 }
 0x787   :  { %v2083_v4 = vrot.slane %v3578_v47, 6 }
 0x788   :  { %3579 = vtanh.f32 %v1854_v32  ;;  %v1861_v44 = vrot.slane %v1854_v32, 4 }
 0x78a   :  { %1928 = vmatmul.mubr.f32.vlgmr.msra.gmra.mrb[14].mxu0 %v1861_v44  ;;  %1999 = vmatmul.mubr.f32.vlgmr.msra.gmra.mrb[14].mxu1 %v1861_v44 }
 0x78b   :  { %3388 = vmatpush3.bf16.msra.mxu0 %v3385_v60  ;;  %2859 = vmatprep.mubr.msk.f32.mxu1 %vm3737_vm2, %v3735_v7 }
 0x78c   :  { %3390 = vmatprep.subr.bf16.mxu0 %v3389_v15 }
 0x78f   :  { %3392 = vmatpush3.bf16.msra.mxu0 %v3389_v15 }
 0x790   :  { %3394 = vmatprep.subr.bf16.mxu0 %v3393_v25 }
 0x792   :  { %v3580_v56 = vpop.eup %3579 }
 0x793   :  { %v2058_v57 = vrot.slane %v3580_v56, 2  ;;  %v4357_v50 = vsel %vm2051_vm1, %v3580_v56, %v2083_v4  ;;  %3396 = vmatpush3.bf16.msra.mxu0 %v3393_v25 }
 0x794   :  { %2086 = vst [vmem:[#allocation3 + $0x8] sm:$0x30] %v4357_v50  ;;  %3398 = vmatprep.subr.bf16.mxu0 %v3397_v30 }
 0x795   :  { %v4362_v61 = vsel %vm2051_vm1, %v3578_v47, %v2058_v57  ;;  %v2041_v47 = vrot.slane %v4351_v22, 6 }
 0x796   :  { %2061 = vst [vmem:[#allocation3] sm:$0xc] %v4362_v61 }
 0x797   :  { %3400 = vmatpush3.bf16.msra.mxu0 %v3397_v30  ;;  %v2305_v30 = vld [vmem:[%s4522_s6] sm:$0xff] }
 0x798   :  { %3402 = vmatprep.subr.bf16.mxu0 %v3401_v42  ;;  %v3418_v37 = vpack.c.bf16 %v2306_v33, %v2305_v30 }
 0x79b   :  { %3404 = vmatpush3.bf16.msra.mxu0 %v3401_v42  ;;  %v3736_v42 = vmov 0.0|0.0  }
 0x79c   :  { %3406 = vmatprep.subr.bf16.mxu0 %v3405_v48  ;;  %3417 = vmatprep.subr.bf16.mxu1 %v3736_v42 }
 0x79d   :  { %3419 = vmatpush3.bf16.msra.mxu1 %v3418_v37 }
 0x79e   :  { %3420 = vmatprep.subr.bf16.mxu1 %v3736_v42 }
 0x79f   :  { %3408 = vmatpush3.bf16.msra.mxu0 %v3405_v48  ;;  %v2309_v48 = vld [vmem:[%s4522_s6 + $0x20] sm:$0xff] }
 0x7a0   :  { %3410 = vmatprep.subr.bf16.mxu0 %v3409_v58  ;;  %v3424_v55 = vpack.c.bf16 %v2310_v52, %v2309_v48 }
 0x7a1   :  { %3422 = vmatpush3.bf16.msra.mxu1 %v3421_v46 }
 0x7a2   :  { %3423 = vmatprep.subr.bf16.mxu1 %v3736_v42 }
 0x7a3   :  { %3412 = vmatpush3.bf16.msra.mxu0 %v3409_v58  ;;  %v2311_v58 = vld [vmem:[%s4522_s6 + $0x30] sm:$0xff] }
 0x7a4   :  { %3414 = vmatprep.subr.bf16.mxu0 %v3413_v11  ;;  %v3427_v1 = vpack.c.bf16 %v2312_v62, %v2311_v58 }
 0x7a5   :  { %3425 = vmatpush3.bf16.msra.mxu1 %v3424_v55 }
 0x7a6   :  { %3426 = vmatprep.subr.bf16.mxu1 %v3736_v42 }
 0x7a7   :  { %3416 = vmatpush3.bf16.msra.mxu0 %v3413_v11  ;;  %v2313_v11 = vld [vmem:[%s4522_s6 + $0x40] sm:$0xff] }
 0x7a8   :  { %3441 = vmatprep.subr.bf16.mxu0 %v3736_v42 }
 0x7a9   :  { %3428 = vmatpush3.bf16.msra.mxu1 %v3427_v1 }
 0x7aa   :  { %3429 = vmatprep.subr.bf16.mxu1 %v3736_v42 }
 0x85d   :  { %v1929_v18 = vpop.f32.mrb[14].mxu0  ;;  %v2000_v24 = vpop.f32.mrb[14].mxu1 }
 0x85e   :  { %v2009_v35 = vrot.slane %v1929_v18, 2  ;;  %v1931_v41 = vpop.f32.mrb[15].mxu0  ;;  %v2002_v43 = vpop.f32.mrb[15].mxu1  ;;  %v2011_v20 = vrot.slane %v2000_v24, 2  ;;  %v2315_v18 = vld [vmem:[%s4522_s6 + $0x50] sm:$0xff]  ;;  %v2316_v24 = vld [vmem:[%s4522_s6 + $0x58] sm:$0xff] }
 0x85f   :  { %v2010_v23 = vrot.slane %v1931_v41, 2  ;;  %v2012_v13 = vrot.slane %v2002_v43, 2  ;;  %v2318_v41 = vld [vmem:[%s4522_s6 + $0x68] sm:$0xff] }
 0x860   :  { %v2017_v51 = vadd.f32 %v2009_v35, %v1856_v16  ;;  %v2019_v27 = vadd.f32 %v2011_v20, %v1858_v49  ;;  %v3433_v35 = vpack.c.bf16 %v2316_v24, %v2315_v18 }
 0x861   :  { %v2018_v53 = vadd.f32 %v2010_v23, %v1857_v38  ;;  %v2020_v19 = vadd.f32 %v2012_v13, %v1859_v31  ;;  %v2317_v38 = vld [vmem:[%s4522_s6 + $0x60] sm:$0xff]  ;;  %v2319_v23 = vld [vmem:[%s4522_s6 + $0x70] sm:$0xff] }
 0x862   :  { %v2713_v54 = vmul.f32 -1.442695, %v2017_v51  ;;  %v3436_v43 = vpack.c.bf16 %v2318_v41, %v2317_v38  ;;  %v2320_v51 = vld [vmem:[%s4522_s6 + $0x78] sm:$0xff]  ;;  %v2716_v31 = vld [vmem:[%s4521_s5] ss:$0 sm:$0xff] }
 0x863   :  { %v2714_v59 = vmul.f32 -1.442695, %v2018_v53  ;;  %v2715_v21 = vmul.f32 -1.442695, %v2020_v19  ;;  %v3439_v53 = vpack.c.bf16 %v2320_v51, %v2319_v23 }
 0x864   :  { %3581 = vpow2.f32 %v2713_v54  ;;  %v2398_v54 = vld [vmem:[%s4524_s8] sm:$0xff] }
 0x865   :  { %3583 = vpow2.f32 %v2714_v59  ;;  %v2399_v59 = vld [vmem:[%s4524_s8 + $0x8] sm:$0xff] }
 0x866   :  { %3585 = vpow2.f32 %v2715_v21  ;;  %v3442_v13 = vpack.c.bf16 %v2399_v59, %v2398_v54 }
 0x867   :  { %3587 = vtanh.f32 %v2019_v27 }
 0x86e   :  { %v3582_v63 = vpop.eup %3581 }
 0x86f   :  { %v3584_v34 = vpop.eup %3583  ;;  %v2027_v3 = vadd.f32 1.0, %v3582_v63 }
 0x870   :  { %v2028_v39 = vadd.f32 1.0, %v3584_v34  ;;  %v3586_v2 = vpop.eup %3585 }
 0x871   :  { %3589 = vrcp.f32 %v2027_v3  ;;  %v3588_v32 = vpop.eup %3587  ;;  %v2037_v57 = vadd.f32 1.0, %v3586_v2 }
 0x872   :  { %3591 = vrcp.f32 %v2028_v39 }
 0x873   :  { %3593 = vrcp.f32 %v2037_v57 }
 0x87b   :  { %v3590_v44 = vpop.eup %3589 }
 0x87c   :  { %v3592_v4 = vpop.eup %3591  ;;  %v2044_v56 = vmul.f32 %v3590_v44, %v3588_v32 }
 0x87d   :  { %v2043_v36 = vmul.f32 %v3592_v4, %v2041_v47  ;;  %v3594_v60 = vpop.eup %3593 }
 0x87f   :  { %v2045_v0 = vadd.f32 %v2044_v56, %v2043_v36 }
 0x881   :  { %3595 = vtanh.f32 %v2045_v0 }
 0x882   :  { %3597 = vtanh.f32 %v4033_v6 }
 0x88b   :  { %v3596_v5 = vpop.eup %3595 }
 0x88c   :  { %v2047_v10 = vmul.f32 %v3596_v5, %v3594_v60  ;;  %v3598_v15 = vpop.eup %3597 }
 0x88d   :  { %v2088_v8 = vrot.slane %v3598_v15, 2 }
 0x88e   :  { %3599 = vtanh.f32 %v2047_v10 }
 0x898   :  { %v3600_v12 = vpop.eup %3599 }
 0x899   :  { %v2053_v25 = vrot.slane %v3600_v12, 6  ;;  %v4417_v22 = vsel %vm2051_vm1, %v3600_v12, %v2088_v8 }
 0x89a   :  { %2091 = vst [vmem:[#allocation3 + $0x8] sm:$0xc0] %v4417_v22 }
 0x89b   :  { %v4422_v17 = vsel %vm2051_vm1, %v3598_v15, %v2053_v25 }
 0x89c   :  { %2056 = vst [vmem:[#allocation3] sm:$0x3] %v4422_v17 }
 0x8a1   :  { %v2093_v26 = vld [vmem:[#allocation3 + $0x8] sm:$0xff] }
 0x8a3   :  { %v2092_v6 = vld [vmem:[#allocation3] sm:$0xff] }
 0x8a4   :  { %2824 = vmatprep.mubr.f32.mxu0 %v2092_v6 }
 0x8a5   :  { %2825 = vmatmul.mubr.f32.vlgmr.msra.gmra.mrb[16].mxu0 %v2093_v26 }
 0x8a6   :  { %2870 = vmatprep.mubr.msk.f32.mxu0 %vm3737_vm2, %v3735_v7  ;;  %v2314_v7 = vld [vmem:[%s4522_s6 + $0x48] sm:$0xff]  ;;  %3443 = vmatpush3.bf16.msra.mxu0 %v3442_v13 }
 0x8a7   :  { %v3430_v16 = vpack.c.bf16 %v2314_v7, %v2313_v11  ;;  %3444 = vmatprep.subr.bf16.mxu0 %v3736_v42 }
 0x8a9   :  { %3431 = vmatpush3.bf16.msra.mxu1 %v3430_v16 }
 0x8aa   :  { %3432 = vmatprep.subr.bf16.mxu1 %v3736_v42 }
 0x8ad   :  { %3434 = vmatpush3.bf16.msra.mxu1 %v3433_v35 }
 0x8ae   :  { %3435 = vmatprep.subr.bf16.mxu1 %v3736_v42 }
 0x8b1   :  { %3437 = vmatpush3.bf16.msra.mxu1 %v3436_v43 }
 0x8b2   :  { %3438 = vmatprep.subr.bf16.mxu1 %v3736_v42 }
 0x8b5   :  { %3440 = vmatpush3.bf16.msra.mxu1 %v3439_v53 }
 0x978   :  { %v2826_v19 = vpop.f32.mrb[16].mxu0 }
 0x979   :  { %v2183_v20 = vpop.f32.mrb[17].mxu0  ;;  %v2189_v34 = vadd.f32 %v2826_v19, %v2716_v31 }
 0x97a   :  { %v2184_v49 = vadd.f32 %v2716_v31, %v2183_v20 }
 0x97b   :  { %v2204_v32 = vrot.slane %v2189_v34, 2  ;;  %v2207_v47 = vrot.slane %v2189_v34, 4  ;;  %v2210_v56 = vrot.slane %v2189_v34, 6 }
 0x97c   :  { %v2193_v21 = vrot.slane %v2184_v49, 2  ;;  %v2196_v63 = vrot.slane %v2184_v49, 4  ;;  %v2199_v39 = vrot.slane %v2184_v49, 6 }
 0x97e   :  { %v2195_v27 = vmax.f32 %v2184_v49, %v2193_v21 }
 0x980   :  { %v2198_v3 = vmax.f32 %v2195_v27, %v2196_v63 }
 0x982   :  { %v2201_v2 = vmax.f32 %v2198_v3, %v2199_v39 }
 0x984   :  { %v2202_v44 = vmax.f32 %v2201_v2, %v2189_v34 }
 0x986   :  { %v2206_v4 = vmax.f32 %v2202_v44, %v2204_v32 }
 0x988   :  { %v2209_v57 = vmax.f32 %v2206_v4, %v2207_v47 }
 0x98a   :  { %v2212_v36 = vmax.f32 %v2209_v57, %v2210_v56 }
 0x98c   :  { %v2213_v0 = vsub.f32 %v2184_v49, %v2212_v36  ;;  %v2217_v60 = vrot.slane %v2212_v36, 6  ;;  %v2222_v5 = vrot.slane %v2212_v36, 4  ;;  %v2227_v10 = vrot.slane %v2212_v36, 2 }
 0x98d   :  { %v2232_v15 = vsub.f32 %v2189_v34, %v2212_v36 }
 0x98e   :  { %v2214_v8 = vmul.f32 1.442695, %v2213_v0  ;;  %v2219_v12 = vsub.f32 %v2184_v49, %v2217_v60  ;;  %v2224_v25 = vsub.f32 %v2184_v49, %v2222_v5  ;;  %v2229_v6 = vsub.f32 %v2184_v49, %v2227_v10 }
 0x98f   :  { %v2235_v26 = vsub.f32 %v2189_v34, %v2217_v60  ;;  %v2238_v30 = vsub.f32 %v2189_v34, %v2222_v5  ;;  %v2241_v33 = vsub.f32 %v2189_v34, %v2227_v10  ;;  %v2233_v46 = vmul.f32 1.442695, %v2232_v15  ;;  %v2717_v10 = vld [vmem:[%s4523_s7] ss:$0 sm:$0xff] }
 0x990   :  { %v2220_v37 = vmul.f32 1.442695, %v2219_v12  ;;  %v2225_v42 = vmul.f32 1.442695, %v2224_v25  ;;  %v2230_v40 = vmul.f32 1.442695, %v2229_v6  ;;  %3601 = vpow2.f32 %v2214_v8 }
 0x991   :  { %v2236_v45 = vmul.f32 1.442695, %v2235_v26  ;;  %v2239_v48 = vmul.f32 1.442695, %v2238_v30  ;;  %v2242_v52 = vmul.f32 1.442695, %v2241_v33 }
 0x992   :  { %3603 = vpow2.f32 %v2220_v37  ;;  %v2718_v25 = vld [vmem:[%s4525_s9] ss:$0 sm:$0xff] }
 0x993   :  { %3605 = vpow2.f32 %v2225_v42 }
 0x994   :  { %3607 = vpow2.f32 %v2230_v40 }
 0x995   :  { %3609 = vpow2.f32 %v2236_v45 }
 0x996   :  { %3611 = vpow2.f32 %v2233_v46 }
 0x997   :  { %3613 = vpow2.f32 %v2239_v48 }
 0x998   :  { %3615 = vpow2.f32 %v2242_v52 }
 0x99a   :  { %v3602_v55 = vpop.eup %3601 }
 0x99b   :  { %v2269_v16 = vmul.f32 %v3602_v55, %v4422_v17 }
 0x99c   :  { %v3604_v58 = vpop.eup %3603 }
 0x99d   :  { %v3606_v62 = vpop.eup %3605  ;;  %v2245_v1 = vrot.slane %v3604_v58, 2  ;;  %v2270_v11 = vmul.f32 %v3604_v58, %v4362_v61 }
 0x99e   :  { %v3608_v7 = vpop.eup %3607  ;;  %v2275_v18 = vmul.f32 %v3606_v62, %v4325_v14  ;;  %v2249_v35 = vrot.slane %v3606_v62, 4 }
 0x99f   :  { %v2247_v24 = vadd.f32 %v3602_v55, %v2245_v1  ;;  %v2272_v38 = vrot.slane %v2270_v11, 2  ;;  %v2280_v41 = vmul.f32 %v3608_v7, %v4272_v28  ;;  %v3610_v43 = vpop.eup %3609  ;;  %v2253_v53 = vrot.slane %v3608_v7, 6 }
 0x9a0   :  { %v3612_v23 = vpop.eup %3611  ;;  %v2277_v59 = vrot.slane %v2275_v18, 4  ;;  %v2287_v20 = vmul.f32 %v3610_v43, %v4316_v9  ;;  %v2258_v21 = vrot.slane %v3610_v43, 2 }
 0x9a1   :  { %v2251_v51 = vadd.f32 %v2249_v35, %v2247_v24  ;;  %v2274_v54 = vadd.f32 %v2272_v38, %v2269_v16  ;;  %v3614_v13 = vpop.eup %3613  ;;  %v2282_v61 = vrot.slane %v2280_v41, 6  ;;  %v2285_v14 = vmul.f32 %v3612_v23, %v4267_v29 }
 0x9a2   :  { %v3616_v17 = vpop.eup %3615  ;;  %v2292_v28 = vmul.f32 %v3614_v13, %v4357_v50  ;;  %v2262_v63 = vrot.slane %v3614_v13, 4  ;;  %v2289_v39 = vrot.slane %v2287_v20, 2  ;;  %v2400_v50 = vld [vmem:[%s4524_s8 + $0x10] sm:$0xff] }
 0x9a3   :  { %v2255_v31 = vadd.f32 %v2253_v53, %v2251_v51  ;;  %v2279_v19 = vadd.f32 %v2277_v59, %v2274_v54  ;;  %v2297_v2 = vmul.f32 %v3616_v17, %v4417_v22  ;;  %v2266_v44 = vrot.slane %v3616_v17, 6  ;;  %v2401_v22 = vld [vmem:[%s4524_s8 + $0x18] sm:$0xff]  ;;  %s3699_s8 = scalar_lea.vmem %s2492_s1, 32 }
 0x9a4   :  { %v2294_v47 = vrot.slane %v2292_v28, 4  ;;  %v3445_v5 = vpack.c.bf16 %v2401_v22, %v2400_v50  ;;  %p3700_p1 = scmp.ne.s32.totalorder %s2492_s1, %s3699_s8  ;;  %p3705_p3 = scmp.lt.s32.totalorder %s3699_s8, %s3699_s8 }
 0x9a5   :  { %v2256_v49 = vadd.f32 %v3612_v23, %v2255_v31  ;;  %v2284_v27 = vadd.f32 %v2282_v61, %v2279_v19  ;;  %v2299_v57 = vrot.slane %v2297_v2, 6 }
 0x9a6   :  { %3446 = vmatpush3.bf16.msra.mxu0 %v3445_v5  ;;  %p3706_p4 = por %p3705_p3, %p3704_p2 }
 0x9a7   :  { %v2260_v34 = vadd.f32 %v2258_v21, %v2256_v49  ;;  %v2286_v3 = vadd.f32 %v2285_v14, %v2284_v27 }
 0x9a8   :  { %p3707_p5 = pnand %p3706_p4, %p3700_p1 }
 0x9a9   :  { %v2264_v32 = vadd.f32 %v2262_v63, %v2260_v34  ;;  %v2291_v4 = vadd.f32 %v2289_v39, %v2286_v3 }
 0x9ab   :  { %v2268_v56 = vadd.f32 %v2266_v44, %v2264_v32  ;;  %v2296_v9 = vadd.f32 %v2294_v47, %v2291_v4 }
 0x9ad   :  { %3617 = vrcp.f32 %v2268_v56  ;;  %v2301_v29 = vadd.f32 %v2299_v57, %v2296_v9 }
 0x9b7   :  { %v3618_v36 = vpop.eup %3617 }
 0x9b8   :  { %v2303_v0 = vmul.f32 %v3618_v36, %v2301_v29 }
 0x9ba   :  { %3619 = vtanh.f32 %v2303_v0 }
 0x9c4   :  { %v3620_v60 = vpop.eup %3619 }
 0x9c5   :  { %2860 = vmatmul.mubr.f32.vlgmr.msra.gmra.mrb[16].mxu1 %v3620_v60 }
 0xa98   :  { %v2394_v15 = vpop.f32.mrb[16].mxu1 }
 0xa99   :  { %v2395_v8 = vadd.f32 %v2717_v10, %v2394_v15  ;;  %v2861_v12 = vpop.f32.mrb[17].mxu1 }
 0xa9b   :  { %2871 = vmatmul.mubr.msk.f32.vlgmr.msra.gmra.mrb[18].mxu0 %vm2409_vm3, %v2395_v8 }
 0xb6e   :  { %v2479_v6 = vpop.f32.mrb[18].mxu0 }
 0xb6f   :  { %v2480_v26 = vadd.f32 %v2718_v25, %v2479_v6  ;;  %v2872_v30 = vpop.f32.mrb[19].mxu0 }
 0xb71   :  { %2484 = vst.msk [vmem:[#allocation12] sm:$0x3] %vm2483_vm4, %v2480_v26 }
 0xb72   :  { %3710 = shalt.err (!%p3707_p5)
}
 0xb73   :  { %s3711_s25 = scalar_lea.hbm %s4526_s10, 32 }
 0xb74   :  { %p3712_p6 = scmp.ne.s32.totalorder %s4526_s10, %s3711_s25  ;;  %p3715_p7 = scmp.lt.u32.totalorder %s3711_s25, %s4526_s10 }
 0xb76   :  { %p3717_p8 = pnand %p3715_p7, %p3712_p6 }
 0xb78   :  { %3720 = shalt.err (!%p3717_p8)
}
 0xb79   :  { %2494 = dma.vmem_to_hbm [thread:$0]  %s2492_s1, 32, %s4526_s10, [#allocation6]  }
 0xb7a   :  { %3727 = dma.done.wait [#allocation6], 32  }
 0xb7b   :  { %3728 = vsyncadd [#allocation6], 4294967264 }
 0xb7c   :  { %2498 = vsyncpa [#allocation5], 1 }
 0xb7d   :  { %2499 = vsyncpa [#allocation10], 1 }
 0xb7e   :  { %2500 = vsyncpa [#allocation6], 1 }
 0xb7f   :  { %2501 = vsyncpa [#allocation7], 1 }

</bundles_post_ra>
